<compile_context>
chip_gen: v6e
topology: v6e:2x2x1
jax: 0.10.0
libtpu: 0.0.40
codegen_flags: <defaults>
</compile_context>

<pallas_src>
import functools

import numpy as np
import jax
import jax.numpy as jnp
from jax import lax
from jax.experimental import pallas as pl
from jax.experimental.pallas import tpu as pltpu


# ---------------------------------------------------------------------------
# Fused Pallas kernel: whole discriminator forward = chain of 2-D MXU matmuls.
# ---------------------------------------------------------------------------

def _fused_forward_kernel(*refs, num_layers, negative_slope):
    # refs layout: [x, (w1, b1), ..., (wL, bL), w_heads, out]
    x_ref = refs[0]
    o_ref = refs[-1]
    wh_ref = refs[1 + 2 * num_layers]

    h = x_ref[...]                                        # (BM, K0) bf16
    for l in range(num_layers):
        w_ref = refs[1 + 2 * l]
        b_ref = refs[2 + 2 * l]
        acc = jnp.dot(h, w_ref[...], preferred_element_type=jnp.float32)
        acc = acc + b_ref[...]                            # (1, N) f32 broadcast
        acc = jnp.where(acc >= 0.0, acc, negative_slope * acc)   # LeakyReLU
        h = acc.astype(jnp.bfloat16)                      # bf16 for next MXU pass

    # Merged heads: [conv_pred | conv_label | zero-pad to 128 lanes].
    # Both PyTorch heads are bias-free (bias=False in the module).
    o_ref[...] = jnp.dot(h, wh_ref[...], preferred_element_type=jnp.float32)


def _tpu_generation():
    """Best-effort TPU generation sniff; only used as a tiling heuristic."""
    try:
        return jax.devices()[0].device_kind.lower()
    except Exception:
        return ""


def _select_block_b(B):
    """Pick the batch (M) tile: fill the MXU height, keep v7x cores busy."""
    kind = _tpu_generation()
    # v5e MXUs are 128x128 -> 256-tall tiles buy nothing and only add f32
    # accumulator/store pressure; v6e/v7x MXUs are 256-tall.
    max_tile = 128 if "v5" in kind else 256
    if B <= 8:
        return B                       # full-dim block, grid=(1,)
    tile = min((B // 8) * 8, max_tile)  # 8-row sublane multiple
    # v7x has 2 TensorCores/chip: the "parallel" batch axis only shards if
    # there are >=2 grid steps, so halve the tile when B permits.
    if "v7" in kind and B >= 16 and pl.cdiv(B, tile) < 2:
        tile = max(8, ((B // 2) // 8) * 8)
    return tile


def fused_forward(x_flat, layer_ws, layer_bs, w_heads, negative_slope=0.01):
    """Single pallas_call running the full discriminator forward."""
    B, K0 = x_flat.shape
    n_out_padded = w_heads.shape[1]          # padded to a 128-lane multiple
    num_layers = len(layer_ws)

    block_b = _select_block_b(B)
    grid = (pl.cdiv(B, block_b),)

    # Weights & biases are invariant across the batch grid: keep them
    # whole-array resident in VMEM (no double-buffering / revisit bookkeeping).
    resident = pl.BlockSpec(memory_space=pltpu.MemorySpace.VMEM)

    operands = [x_flat]
    in_specs = [pl.BlockSpec((block_b, K0), lambda i: (i, 0))]
    for w, b in zip(layer_ws, layer_bs):
        operands += [w, b]
        in_specs += [resident, resident]
    operands.append(w_heads)
    in_specs.append(resident)

    kernel = functools.partial(_fused_forward_kernel,
                               num_layers=num_layers,
                               negative_slope=negative_slope)
    return pl.pallas_call(
        kernel,
        out_shape=jax.ShapeDtypeStruct((B, n_out_padded), jnp.float32),
        grid=grid,
        in_specs=in_specs,
        out_specs=pl.BlockSpec((block_b, n_out_padded), lambda i: (i, 0)),
        compiler_params=pltpu.CompilerParams(
            dimension_semantics=("parallel",)),
    )(*operands)


# ---------------------------------------------------------------------------
# Host-side (numpy) lowering: conv2d -> dense unrolled GEMM matrix.
# ---------------------------------------------------------------------------

def _unroll_conv_np(w_oihw, H, W, stride, pad, in_layout):
    """Build M with  x_flat @ M == conv2d(x, w)_flat  (padding folded in).

    Input  flat layout: 'nchw' -> row = (ci*H + h)*W + w
                        'nhwc' -> row = (h*W + w)*Cin + ci
    Output flat layout: NHWC   -> col = (oh*Wo + ow)*Cout + co
    """
    w = np.asarray(w_oihw, np.float32)
    Cout, Cin, KH, KW = w.shape
    Ho = (H + 2 * pad - KH) // stride + 1
    Wo = (W + 2 * pad - KW) // stride + 1
    M = np.zeros((Cin * H * W, Ho * Wo * Cout), np.float32)
    for oh in range(Ho):
        for ow in range(Wo):
            col = (oh * Wo + ow) * Cout
            for ki in range(KH):
                ih = oh * stride + ki - pad
                if ih < 0 or ih >= H:
                    continue
                for kj in range(KW):
                    iw = ow * stride + kj - pad
                    if iw < 0 or iw >= W:
                        continue
                    for ci in range(Cin):
                        if in_layout == "nchw":
                            row = (ci * H + ih) * W + iw
                        else:
                            row = (ih * W + iw) * Cin + ci
                        M[row, col:col + Cout] = w[:, ci, ki, kj]
    return M, Ho, Wo


def prepare_kernel_params(params, image_h, image_w):
    """One-time lowering of all conv weights to fused-kernel operands."""
    layer_ws, layer_bs = [], []
    H, W = image_h, image_w
    in_layout = "nchw"   # fold NCHW->NHWC transpose into layer 1's matrix
    for (w, b) in params["main"]:
        M, Ho, Wo = _unroll_conv_np(np.asarray(w), H, W, stride=2, pad=1,
                                    in_layout=in_layout)
        layer_ws.append(jnp.asarray(M, jnp.bfloat16))
        b_full = np.tile(np.asarray(b, np.float32), Ho * Wo)[None, :]
        layer_bs.append(jnp.asarray(b_full, jnp.float32))
        H, W = Ho, Wo
        in_layout = "nhwc"

    # Heads on the final NHWC-flat activation; concatenated into one matrix
    # and zero-padded to a 128-lane multiple (lane-dense output writeback).
    Mp, Hp, Wp = _unroll_conv_np(np.asarray(params["w_pred"]), H, W,
                                 stride=1, pad=1, in_layout="nhwc")
    Ml, Hl, Wl = _unroll_conv_np(np.asarray(params["w_label"]), H, W,
                                 stride=1, pad=0, in_layout="nhwc")
    assert Hl == 1 and Wl == 1
    heads = np.concatenate([Mp, Ml], axis=1)
    n_out = heads.shape[1]
    n_out_padded = max(128, ((n_out + 127) // 128) * 128)
    if n_out_padded != n_out:
        heads = np.concatenate(
            [heads, np.zeros((heads.shape[0], n_out_padded - n_out),
                             np.float32)], axis=1)
    w_heads = jnp.asarray(heads, jnp.bfloat16)

    return {
        "layer_ws": tuple(layer_ws),
        "layer_bs": tuple(layer_bs),
        "w_heads": w_heads,
        "pred_hw": (Hp, Wp),
        "n_out": n_out,
    }


# ---------------------------------------------------------------------------
# Parameters (PyTorch-style OIHW conv weights) + forward wrapper
# ---------------------------------------------------------------------------

def init_discriminator_params(key, image_h, image_w, c_dim=3, conv_dim=8,
                              repeat_num=3):
    params = {"main": []}
    in_c = 3
    curr_dim = conv_dim
    k = key
    for i in range(repeat_num):
        out_c = conv_dim * (2 ** i)
        k, kw_, kb_ = jax.random.split(k, 3)
        w = jax.random.normal(kw_, (out_c, in_c, 4, 4), jnp.float32) * 0.05
        b = jax.random.normal(kb_, (out_c,), jnp.float32) * 0.05
        params["main"].append((w, b))
        in_c = out_c
        curr_dim = out_c
    kh = image_h // (2 ** repeat_num)
    kw = image_w // (2 ** repeat_num)
    k, kp, kl = jax.random.split(k, 3)
    params["w_pred"] = jax.random.normal(kp, (1, curr_dim, 3, 3), jnp.float32) * 0.05
    params["w_label"] = jax.random.normal(kl, (c_dim, curr_dim, kh, kw), jnp.float32) * 0.05
    return params


@functools.partial(jax.jit, static_argnames=("pred_h", "pred_w", "c_dim"))
def discriminator_forward(x_nchw, layer_ws, layer_bs, w_heads, *,
                          pred_h, pred_w, c_dim):
    """Input NCHW; returns (pred NCHW with 1 channel, labels (N, c_dim))."""
    n = x_nchw.shape[0]
    x_flat = x_nchw.reshape(n, -1).astype(jnp.bfloat16)   # NCHW-flat (free reshape)
    out = fused_forward(x_flat, layer_ws, layer_bs, w_heads)
    n_pred = pred_h * pred_w
    # conv_pred has a single channel, so NHWC-flat == NCHW: pure reshape.
    pred = out[:, :n_pred].reshape(n, 1, pred_h, pred_w)
    labels = out[:, n_pred:n_pred + c_dim]
    return pred, labels


# ---------------------------------------------------------------------------
# Pure-JAX reference (lax.conv) for correctness check
# ---------------------------------------------------------------------------

def reference_forward(x, params):
    dn = ("NCHW", "OIHW", "NCHW")
    h = x.astype(jnp.float32)
    for (w, b) in params["main"]:
        h = lax.conv_general_dilated(h, w, (2, 2), ((1, 1), (1, 1)),
                                     dimension_numbers=dn,
                                     precision=lax.Precision.HIGHEST)
        h = h + b[None, :, None, None]
        h = jnp.where(h >= 0, h, 0.01 * h)
    pred = lax.conv_general_dilated(h, params["w_pred"], (1, 1), ((1, 1), (1, 1)),
                                    dimension_numbers=dn,
                                    precision=lax.Precision.HIGHEST)
    lab = lax.conv_general_dilated(h, params["w_label"], (1, 1), "VALID",
                                   dimension_numbers=dn,
                                   precision=lax.Precision.HIGHEST)
    return pred, lab.reshape(lab.shape[0], lab.shape[1])


# ---------------------------------------------------------------------------

if __name__ == "__main__":
    # Small config consistent with the module structure:
    #   image 16x16, conv_dim=8, repeat_num=3, c_dim=3
    image_h = image_w = 16
    c_dim, conv_dim, repeat_num = 3, 8, 3

    key = jax.random.PRNGKey(0)
    kx_small, kx_big, kp = jax.random.split(key, 3)
    params = init_discriminator_params(kp, image_h, image_w, c_dim=c_dim,
                                       conv_dim=conv_dim, repeat_num=repeat_num)

    kparams = prepare_kernel_params(params, image_h, image_w)
    pred_h, pred_w = kparams["pred_hw"]

    # batch=2 exercises the full-dim (grid=1) path; batch=16 exercises the
    # 8-row-multiple batch tiling / multi-step "parallel" grid path.
    for batch, kx in ((2, kx_small), (16, kx_big)):
        x = jax.random.normal(kx, (batch, 3, image_h, image_w), jnp.float32)

        pred, labels = discriminator_forward(
            x, kparams["layer_ws"], kparams["layer_bs"], kparams["w_heads"],
            pred_h=pred_h, pred_w=pred_w, c_dim=c_dim)
        pred = jax.block_until_ready(pred)
        labels = jax.block_until_ready(labels)

        # Shape checks (match PyTorch module semantics)
        assert pred.shape == (batch, 1, image_h // 2 ** repeat_num,
                              image_w // 2 ** repeat_num), pred.shape
        assert labels.shape == (batch, c_dim), labels.shape

        # Numerical check against f32 lax.conv reference (kernel uses bf16 MXU
        # inputs with f32 accumulation -> expect ~1e-3 level deltas).
        pred_ref, labels_ref = reference_forward(x, params)
        err_p = float(jnp.max(jnp.abs(pred - pred_ref)))
        err_l = float(jnp.max(jnp.abs(labels - labels_ref)))
        assert err_p < 3e-2, (batch, err_p)
        assert err_l < 3e-2, (batch, err_l)

    print("KERNEL_OK")
</pallas_src>

<mosaic_0001>
module attributes {stable_mosaic.version = 11 : i64} {
  func.func @_fused_forward_kernel(%arg0: i32, %arg1: memref<2x768xbf16, #tpu.memory_space<vmem>>, %arg2: memref<768x512xbf16, #tpu.memory_space<vmem>>, %arg3: memref<1x512xf32, #tpu.memory_space<vmem>>, %arg4: memref<512x256xbf16, #tpu.memory_space<vmem>>, %arg5: memref<1x256xf32, #tpu.memory_space<vmem>>, %arg6: memref<256x128xbf16, #tpu.memory_space<vmem>>, %arg7: memref<1x128xf32, #tpu.memory_space<vmem>>, %arg8: memref<128x128xbf16, #tpu.memory_space<vmem>>, %arg9: memref<2x128xf32, #tpu.memory_space<vmem>>) attributes {dimension_semantics = [#tpu.dimension_semantics<parallel>], iteration_bounds = array<i64: 1>, scalar_prefetch = 0 : i64, scratch_operands = 0 : i64, tpu.core_type = #tpu.core_type<tc>, window_params = [{transform_indices = @transform_0, window_bounds = array<i64: 2, 768>}, {pipeline_mode = #tpu.pipeline_mode<synchronous>, transform_indices = @transform_1, window_bounds = array<i64: 768, 512>}, {pipeline_mode = #tpu.pipeline_mode<synchronous>, transform_indices = @transform_2, window_bounds = array<i64: 1, 512>}, {pipeline_mode = #tpu.pipeline_mode<synchronous>, transform_indices = @transform_3, window_bounds = array<i64: 512, 256>}, {pipeline_mode = #tpu.pipeline_mode<synchronous>, transform_indices = @transform_4, window_bounds = array<i64: 1, 256>}, {pipeline_mode = #tpu.pipeline_mode<synchronous>, transform_indices = @transform_5, window_bounds = array<i64: 256, 128>}, {pipeline_mode = #tpu.pipeline_mode<synchronous>, transform_indices = @transform_6, window_bounds = array<i64: 1, 128>}, {pipeline_mode = #tpu.pipeline_mode<synchronous>, transform_indices = @transform_7, window_bounds = array<i64: 128, 128>}, {transform_indices = @transform_8, window_bounds = array<i64: 2, 128>}]} {
    %c0 = arith.constant 0 : index
    %c0_0 = arith.constant 0 : index
    %0 = vector.load %arg1[%c0, %c0_0] : memref<2x768xbf16, #tpu.memory_space<vmem>>, vector<2x768xbf16>
    %c0_1 = arith.constant 0 : index
    %c0_2 = arith.constant 0 : index
    %1 = vector.load %arg2[%c0_1, %c0_2] : memref<768x512xbf16, #tpu.memory_space<vmem>>, vector<768x512xbf16>
    %cst = arith.constant dense<0.000000e+00> : vector<2x512xf32>
    %2 = tpu.matmul %0, %1, %cst {dimension_numbers = #tpu.dot_dimension_numbers<[1], [0], [0], [1], [0, 0, 1, 1], [], []>} : vector<2x768xbf16>, vector<768x512xbf16>, vector<2x512xf32> -> vector<2x512xf32>
    %c0_3 = arith.constant 0 : index
    %c0_4 = arith.constant 0 : index
    %3 = vector.load %arg3[%c0_3, %c0_4] : memref<1x512xf32, #tpu.memory_space<vmem>>, vector<1x512xf32>
    %4 = vector.broadcast %3 : vector<1x512xf32> to vector<2x512xf32>
    %5 = arith.addf %2, %4 : vector<2x512xf32>
    %cst_5 = arith.constant 0.000000e+00 : f32
    %6 = vector.broadcast %cst_5 : f32 to vector<2x512xf32>
    %7 = arith.cmpf oge, %5, %6 : vector<2x512xf32>
    %cst_6 = arith.constant 0.00999999977 : f32
    %8 = vector.broadcast %cst_6 : f32 to vector<2x512xf32>
    %9 = arith.mulf %8, %5 : vector<2x512xf32>
    %10 = arith.select %7, %5, %9 : vector<2x512xi1>, vector<2x512xf32>
    %11 = arith.truncf %10 : vector<2x512xf32> to vector<2x512xbf16>
    %c0_7 = arith.constant 0 : index
    %c0_8 = arith.constant 0 : index
    %12 = vector.load %arg4[%c0_7, %c0_8] : memref<512x256xbf16, #tpu.memory_space<vmem>>, vector<512x256xbf16>
    %cst_9 = arith.constant dense<0.000000e+00> : vector<2x256xf32>
    %13 = tpu.matmul %11, %12, %cst_9 {dimension_numbers = #tpu.dot_dimension_numbers<[1], [0], [0], [1], [0, 0, 1, 1], [], []>} : vector<2x512xbf16>, vector<512x256xbf16>, vector<2x256xf32> -> vector<2x256xf32>
    %c0_10 = arith.constant 0 : index
    %c0_11 = arith.constant 0 : index
    %14 = vector.load %arg5[%c0_10, %c0_11] : memref<1x256xf32, #tpu.memory_space<vmem>>, vector<1x256xf32>
    %15 = vector.broadcast %14 : vector<1x256xf32> to vector<2x256xf32>
    %16 = arith.addf %13, %15 : vector<2x256xf32>
    %cst_12 = arith.constant 0.000000e+00 : f32
    %17 = vector.broadcast %cst_12 : f32 to vector<2x256xf32>
    %18 = arith.cmpf oge, %16, %17 : vector<2x256xf32>
    %cst_13 = arith.constant 0.00999999977 : f32
    %19 = vector.broadcast %cst_13 : f32 to vector<2x256xf32>
    %20 = arith.mulf %19, %16 : vector<2x256xf32>
    %21 = arith.select %18, %16, %20 : vector<2x256xi1>, vector<2x256xf32>
    %22 = arith.truncf %21 : vector<2x256xf32> to vector<2x256xbf16>
    %c0_14 = arith.constant 0 : index
    %c0_15 = arith.constant 0 : index
    %23 = vector.load %arg6[%c0_14, %c0_15] : memref<256x128xbf16, #tpu.memory_space<vmem>>, vector<256x128xbf16>
    %cst_16 = arith.constant dense<0.000000e+00> : vector<2x128xf32>
    %24 = tpu.matmul %22, %23, %cst_16 {dimension_numbers = #tpu.dot_dimension_numbers<[1], [0], [0], [1], [0, 0, 1, 1], [], []>} : vector<2x256xbf16>, vector<256x128xbf16>, vector<2x128xf32> -> vector<2x128xf32>
    %c0_17 = arith.constant 0 : index
    %c0_18 = arith.constant 0 : index
    %25 = vector.load %arg7[%c0_17, %c0_18] : memref<1x128xf32, #tpu.memory_space<vmem>>, vector<1x128xf32>
    %26 = vector.broadcast %25 : vector<1x128xf32> to vector<2x128xf32>
    %27 = arith.addf %24, %26 : vector<2x128xf32>
    %cst_19 = arith.constant 0.000000e+00 : f32
    %28 = vector.broadcast %cst_19 : f32 to vector<2x128xf32>
    %29 = arith.cmpf oge, %27, %28 : vector<2x128xf32>
    %cst_20 = arith.constant 0.00999999977 : f32
    %30 = vector.broadcast %cst_20 : f32 to vector<2x128xf32>
    %31 = arith.mulf %30, %27 : vector<2x128xf32>
    %32 = arith.select %29, %27, %31 : vector<2x128xi1>, vector<2x128xf32>
    %33 = arith.truncf %32 : vector<2x128xf32> to vector<2x128xbf16>
    %c0_21 = arith.constant 0 : index
    %c0_22 = arith.constant 0 : index
    %34 = vector.load %arg8[%c0_21, %c0_22] : memref<128x128xbf16, #tpu.memory_space<vmem>>, vector<128x128xbf16>
    %cst_23 = arith.constant dense<0.000000e+00> : vector<2x128xf32>
    %35 = tpu.matmul %33, %34, %cst_23 {dimension_numbers = #tpu.dot_dimension_numbers<[1], [0], [0], [1], [0, 0, 1, 1], [], []>} : vector<2x128xbf16>, vector<128x128xbf16>, vector<2x128xf32> -> vector<2x128xf32>
    %c0_24 = arith.constant 0 : index
    %c0_25 = arith.constant 0 : index
    %36 = vector.load %arg9[%c0_24, %c0_25] : memref<2x128xf32, #tpu.memory_space<vmem>>, vector<2x128xf32>
    tpu.vector_store %arg9[%c0_24, %c0_25], %35 {strides = array<i32>} : memref<2x128xf32, #tpu.memory_space<vmem>>, vector<2x128xf32>,
    return
  }
  func.func @transform_0(%arg0: i32) -> (i32, i32) {
    %c0_i32 = arith.constant 0 : i32
    %c0_i32_0 = arith.constant 0 : i32
    return %arg0, %c0_i32 : i32, i32
  }
  func.func @transform_1(%arg0: i32) -> (i32, i32) {
    %c0_i32 = arith.constant 0 : i32
    %c0_i32_0 = arith.constant 0 : i32
    %c0_i32_1 = arith.constant 0 : i32
    return %c0_i32, %c0_i32_0 : i32, i32
  }
  func.func @transform_2(%arg0: i32) -> (i32, i32) {
    %c0_i32 = arith.constant 0 : i32
    %c0_i32_0 = arith.constant 0 : i32
    %c0_i32_1 = arith.constant 0 : i32
    return %c0_i32, %c0_i32_0 : i32, i32
  }
  func.func @transform_3(%arg0: i32) -> (i32, i32) {
    %c0_i32 = arith.constant 0 : i32
    %c0_i32_0 = arith.constant 0 : i32
    %c0_i32_1 = arith.constant 0 : i32
    return %c0_i32, %c0_i32_0 : i32, i32
  }
  func.func @transform_4(%arg0: i32) -> (i32, i32) {
    %c0_i32 = arith.constant 0 : i32
    %c0_i32_0 = arith.constant 0 : i32
    %c0_i32_1 = arith.constant 0 : i32
    return %c0_i32, %c0_i32_0 : i32, i32
  }
  func.func @transform_5(%arg0: i32) -> (i32, i32) {
    %c0_i32 = arith.constant 0 : i32
    %c0_i32_0 = arith.constant 0 : i32
    %c0_i32_1 = arith.constant 0 : i32
    return %c0_i32, %c0_i32_0 : i32, i32
  }
  func.func @transform_6(%arg0: i32) -> (i32, i32) {
    %c0_i32 = arith.constant 0 : i32
    %c0_i32_0 = arith.constant 0 : i32
    %c0_i32_1 = arith.constant 0 : i32
    return %c0_i32, %c0_i32_0 : i32, i32
  }
  func.func @transform_7(%arg0: i32) -> (i32, i32) {
    %c0_i32 = arith.constant 0 : i32
    %c0_i32_0 = arith.constant 0 : i32
    %c0_i32_1 = arith.constant 0 : i32
    return %c0_i32, %c0_i32_0 : i32, i32
  }
  func.func @transform_8(%arg0: i32) -> (i32, i32) {
    %c0_i32 = arith.constant 0 : i32
    %c0_i32_0 = arith.constant 0 : i32
    return %arg0, %c0_i32 : i32, i32
  }
}

</mosaic_0001>

<bundles_post_ra>
// kernel: discriminator_forward.1
= control target key start
LH: loop header
LB: loop body
LE: loop exit
PB: predicated region body
PF: predicated region fallthrough
CT: control target
= control target key end

     0   :  { %13 = vsyncpa [#allocation3], 0  ;;  %s3311_s0 = inlined_call_operand.vmem [shape: bf16[2,768], index: 0, kind: input, shape index: {}]   ;;  %s3312_s1 = inlined_call_operand.hbm [shape: bf16[768,512], index: 1, kind: input, shape index: {}]   ;;  %s3313_s2 = inlined_call_operand.vmem [shape: f32[1,512], index: 2, kind: input, shape index: {}]   ;;  %s3314_s3 = inlined_call_operand.hbm [shape: bf16[512,256], index: 3, kind: input, shape index: {}]   ;;  %s3315_s4 = inlined_call_operand.vmem [shape: f32[1,256], index: 4, kind: input, shape index: {}]   ;;  %s3316_s5 = inlined_call_operand.vmem [shape: bf16[256,128], index: 5, kind: input, shape index: {}]   ;;  %s3317_s6 = inlined_call_operand.vmem [shape: f32[1,128], index: 6, kind: input, shape index: {}]   ;;  %s3318_s7 = inlined_call_operand.vmem [shape: bf16[128,128], index: 7, kind: input, shape index: {}]   ;;  %s3319_s8 = inlined_call_operand.vmem [shape: f32[2,128], index: 8, kind: output, shape index: {}]  }
   0x1   :  { %14 = vsyncpa [#allocation5], 0  ;;  %s3119_s27 = smov [#allocation2]  }
   0x2   :  { %s22_s28 = sshll.u32 %s3119_s27, 4  ;;  %s23_s28 = int_to_ptr.vmem [resolvable:$true] %s22_s28 }
   0x3   :  { %s3083_s29 = scalar_lea.vmem %s23_s28, 24576  ;;  %p3088_p1 = scmp.lt.s32.totalorder %s23_s28, %s23_s28 }
   0x4   :  { %p3084_p0 = scmp.ne.s32.totalorder %s23_s28, %s3083_s29  ;;  %p3089_p2 = scmp.lt.s32.totalorder %s3083_s29, %s3083_s29 }
   0x6   :  { %p3090_p3 = por %p3089_p2, %p3088_p1 }
   0x8   :  { %p3091_p4 = pnand %p3090_p3, %p3084_p0 }
   0xa   :  { %3094 = shalt.err (!%p3091_p4)
}
   0xb   :  { %s3120_s30 = smov 256   ;;  %s3121_s9 = smov 16  }
   0xc   :  { %28 = dma.hbm_to_vmem [thread:$0]  %s3312_s1, 24576, %s23_s28, [#allocation3], %s3120_s30, %s3120_s30, %s3121_s9  }
   0xd   :  { %s3122_s12 = smov [#allocation4]  }
   0xe   :  { %s36_s13 = sshll.u32 %s3122_s12, 4  ;;  %s37_s13 = int_to_ptr.vmem [resolvable:$true] %s36_s13 }
   0xf   :  { %s3103_s14 = scalar_lea.vmem %s37_s13, 8192  ;;  %p3108_p6 = scmp.lt.s32.totalorder %s37_s13, %s37_s13 }
  0x10   :  { %p3104_p5 = scmp.ne.s32.totalorder %s37_s13, %s3103_s14  ;;  %p3109_p7 = scmp.lt.s32.totalorder %s3103_s14, %s3103_s14 }
  0x12   :  { %p3110_p8 = por %p3109_p7, %p3108_p6 }
  0x14   :  { %p3111_p9 = pnand %p3110_p8, %p3104_p5 }
  0x16   :  { %3114 = shalt.err (!%p3111_p9)
}
  0x17   :  { %s3123_s15 = smov 128   ;;  %s3124_s16 = smov 8  }
  0x18   :  { %42 = dma.hbm_to_vmem [thread:$0]  %s3314_s3, 8192, %s37_s13, [#allocation5], %s3123_s15, %s3123_s15, %s3124_s16  }
  0x19   :  { %3115 = dma.done.wait [#allocation3], 24576  }
  0x1a   :  { %3116 = vsyncadd [#allocation3], 4294942720 }
  0x1b   :  { %3117 = dma.done.wait [#allocation5], 8192  }
  0x1c   :  { %3118 = vsyncadd [#allocation5], 4294959104  ;;  %v2666_v0 = vld [vmem:[#allocation2 + $0xe4] ss:$16 sps:$4 sm:$0xff]   ;;  %v2670_v2 = vld [vmem:[#allocation2 + $0xe0] ss:$16 sps:$4 sm:$0xff]   ;;  %v253_v36 = vlaneseq }
  0x1d   :  { %v2668_v1 = vld [vmem:[#allocation2 + $0x2e4] ss:$16 sps:$4 sm:$0xff]   ;;  %1287 = vmatprep.subr.bf16.mxu0 %v2666_v0  ;;  %v2671_v3 = vld [vmem:[#allocation2 + $0x2e0] ss:$16 sps:$4 sm:$0xff]   ;;  %v3125_v37 = vmov 1966171168  }
  0x1e   :  { %1328 = vmatprep.subr.bf16.mxu1 %v2668_v1  ;;  %v2672_v4 = vld [vmem:[#allocation2 + $0xc4] ss:$16 sps:$4 sm:$0xff]   ;;  %1288 = vmatpush1.bf16.msra.mxu0 %v2670_v2  ;;  %v2676_v6 = vld [vmem:[#allocation2 + $0xc0] ss:$16 sps:$4 sm:$0xff]   ;;  %v276_v38 = vunpack.c.l.s4 %v3125_v37  ;;  %v3179_v42 = vshrl.u32 %v253_v36, 7  ;;  %vm3127_vm6 = vmmov 0  }
  0x1f   :  { %1329 = vmatpush1.bf16.msra.mxu1 %v2671_v3  ;;  %v2674_v5 = vld [vmem:[#allocation2 + $0x2c4] ss:$16 sps:$4 sm:$0xff]   ;;  %1289 = vmatprep.subr.bf16.mxu0 %v2672_v4  ;;  %v2677_v7 = vld [vmem:[#allocation2 + $0x2c0] ss:$16 sps:$4 sm:$0xff]   ;;  %v2789_v37 = vld [vmem:[#allocation2 + $0x68] ss:$16 sps:$4 sm:$0xff]  }
  0x20   :  { %1330 = vmatprep.subr.bf16.mxu1 %v2674_v5  ;;  %v2678_v8 = vld [vmem:[#allocation2 + $0xa4] ss:$16 sps:$4 sm:$0xff]   ;;  %v2682_v10 = vld [vmem:[#allocation2 + $0xa0] ss:$16 sps:$4 sm:$0xff]   ;;  %v277_v43 = vunpack.c.0.s8 %v276_v38 }
  0x21   :  { %v2680_v9 = vld [vmem:[#allocation2 + $0x2a4] ss:$16 sps:$4 sm:$0xff]   ;;  %v2683_v11 = vld [vmem:[#allocation2 + $0x2a0] ss:$16 sps:$4 sm:$0xff]  }
  0x22   :  { %1290 = vmatpush1.bf16.msra.mxu0 %v2676_v6  ;;  %v2684_v12 = vld [vmem:[#allocation2 + $0x84] ss:$16 sps:$4 sm:$0xff]   ;;  %v2688_v14 = vld [vmem:[#allocation2 + $0x80] ss:$16 sps:$4 sm:$0xff]   ;;  %v3182_v49 = vsub.s32 %v277_v43, %v3179_v42 }
  0x23   :  { %1331 = vmatpush1.bf16.msra.mxu1 %v2677_v7  ;;  %1291 = vmatprep.subr.bf16.mxu0 %v2678_v8  ;;  %v2686_v13 = vld [vmem:[#allocation2 + $0x284] ss:$16 sps:$4 sm:$0xff]   ;;  %v2689_v15 = vld [vmem:[#allocation2 + $0x280] ss:$16 sps:$4 sm:$0xff]  }
  0x24   :  { %1332 = vmatprep.subr.bf16.mxu1 %v2680_v9  ;;  %v2690_v16 = vld [vmem:[#allocation2 + $0x64] ss:$16 sps:$4 sm:$0xff]   ;;  %v2694_v18 = vld [vmem:[#allocation2 + $0x60] ss:$16 sps:$4 sm:$0xff]  }
  0x25   :  { %v2692_v17 = vld [vmem:[#allocation2 + $0x264] ss:$16 sps:$4 sm:$0xff]   ;;  %v2695_v19 = vld [vmem:[#allocation2 + $0x260] ss:$16 sps:$4 sm:$0xff]  }
  0x26   :  { %1292 = vmatpush1.bf16.msra.mxu0 %v2682_v10  ;;  %v2696_v20 = vld [vmem:[#allocation2 + $0x44] ss:$16 sps:$4 sm:$0xff]   ;;  %v2700_v22 = vld [vmem:[#allocation2 + $0x40] ss:$16 sps:$4 sm:$0xff]  }
  0x27   :  { %1333 = vmatpush1.bf16.msra.mxu1 %v2683_v11  ;;  %1293 = vmatprep.subr.bf16.mxu0 %v2684_v12  ;;  %v2698_v21 = vld [vmem:[#allocation2 + $0x244] ss:$16 sps:$4 sm:$0xff]   ;;  %v2701_v23 = vld [vmem:[#allocation2 + $0x240] ss:$16 sps:$4 sm:$0xff]  }
  0x28   :  { %1334 = vmatprep.subr.bf16.mxu1 %v2686_v13  ;;  %v2702_v24 = vld [vmem:[#allocation2 + $0x24] ss:$16 sps:$4 sm:$0xff]   ;;  %v2706_v26 = vld [vmem:[#allocation2 + $0x20] ss:$16 sps:$4 sm:$0xff]  }
  0x29   :  { %v2704_v25 = vld [vmem:[#allocation2 + $0x224] ss:$16 sps:$4 sm:$0xff]   ;;  %v2707_v27 = vld [vmem:[#allocation2 + $0x220] ss:$16 sps:$4 sm:$0xff]  }
  0x2a   :  { %1294 = vmatpush1.bf16.msra.mxu0 %v2688_v14  ;;  %v2708_v28 = vld [vmem:[#allocation2 + $0x4] ss:$16 sps:$4 sm:$0xff]   ;;  %v2712_v30 = vld [vmem:[#allocation2] ss:$16 sps:$4 sm:$0xff]  }
  0x2b   :  { %1335 = vmatpush1.bf16.msra.mxu1 %v2689_v15  ;;  %1295 = vmatprep.subr.bf16.mxu0 %v2690_v16  ;;  %v2710_v29 = vld [vmem:[#allocation2 + $0x204] ss:$16 sps:$4 sm:$0xff]   ;;  %v2713_v31 = vld [vmem:[#allocation2 + $0x200] ss:$16 sps:$4 sm:$0xff]   ;;  %v2767_v16 = vld [vmem:[#allocation2 + $0xec] ss:$16 sps:$4 sm:$0xff]  }
  0x2c   :  { %1336 = vmatprep.subr.bf16.mxu1 %v2692_v17  ;;  %v2714_v32 = vld [vmem:[#allocation2 + $0x1e4] ss:$16 sps:$4 sm:$0xff]   ;;  %v2718_v34 = vld [vmem:[#allocation2 + $0x1e0] ss:$16 sps:$4 sm:$0xff]  }
  0x2d   :  { %v2716_v33 = vld [vmem:[#allocation2 + $0x3e4] ss:$16 sps:$4 sm:$0xff]   ;;  %v2719_v35 = vld [vmem:[#allocation2 + $0x3e0] ss:$16 sps:$4 sm:$0xff]  }
  0x2e   :  { %1296 = vmatpush1.bf16.msra.mxu0 %v2694_v18  ;;  %v2720_v39 = vld [vmem:[#allocation2 + $0x1c4] ss:$16 sps:$4 sm:$0xff]   ;;  %v2724_v41 = vld [vmem:[#allocation2 + $0x1c0] ss:$16 sps:$4 sm:$0xff]  }
  0x2f   :  { %1337 = vmatpush1.bf16.msra.mxu1 %v2695_v19  ;;  %1297 = vmatprep.subr.bf16.mxu0 %v2696_v20  ;;  %v2722_v40 = vld [vmem:[#allocation2 + $0x3c4] ss:$16 sps:$4 sm:$0xff]   ;;  %v2725_v44 = vld [vmem:[#allocation2 + $0x3c0] ss:$16 sps:$4 sm:$0xff]   ;;  %v2765_v20 = vld [vmem:[#allocation2 + $0xe8] ss:$16 sps:$4 sm:$0xff]  }
  0x30   :  { %1338 = vmatprep.subr.bf16.mxu1 %v2698_v21  ;;  %v2726_v45 = vld [vmem:[#allocation2 + $0x1a4] ss:$16 sps:$4 sm:$0xff]   ;;  %v2730_v47 = vld [vmem:[#allocation2 + $0x1a0] ss:$16 sps:$4 sm:$0xff]  }
  0x31   :  { %v2728_v46 = vld [vmem:[#allocation2 + $0x3a4] ss:$16 sps:$4 sm:$0xff]   ;;  %v2731_v48 = vld [vmem:[#allocation2 + $0x3a0] ss:$16 sps:$4 sm:$0xff]  }
  0x32   :  { %1298 = vmatpush1.bf16.msra.mxu0 %v2700_v22  ;;  %v2732_v50 = vld [vmem:[#allocation2 + $0x184] ss:$16 sps:$4 sm:$0xff]   ;;  %v2736_v53 = vld [vmem:[#allocation2 + $0x180] ss:$16 sps:$4 sm:$0xff]   ;;  %v2773_v22 = vld [vmem:[#allocation2 + $0xcc] ss:$16 sps:$4 sm:$0xff]  }
  0x33   :  { %1339 = vmatpush1.bf16.msra.mxu1 %v2701_v23  ;;  %1299 = vmatprep.subr.bf16.mxu0 %v2702_v24  ;;  %v2734_v51 = vld [vmem:[#allocation2 + $0x384] ss:$16 sps:$4 sm:$0xff]   ;;  %v2737_v56 = vld [vmem:[#allocation2 + $0x380] ss:$16 sps:$4 sm:$0xff]  }
  0x34   :  { %1340 = vmatprep.subr.bf16.mxu1 %v2704_v25  ;;  %v58_v52 = vld [vmem:[%s3311_s0] sm:$0x3f]  ;;  %v2771_v25 = vld [vmem:[#allocation2 + $0xc8] ss:$16 sps:$4 sm:$0xff]  }
  0x35   :  { %v281_v54 = vrot.slane %v58_v52, %v3182_v49  ;;  %v274_v55 = vcombine.high %v58_v52, %v58_v52  ;;  %v2738_v57 = vld [vmem:[#allocation2 + $0x164] ss:$16 sps:$4 sm:$0xff]   ;;  %v2742_v61 = vld [vmem:[#allocation2 + $0x160] ss:$16 sps:$4 sm:$0xff]   ;;  %v2815_v52 = vld [vmem:[#allocation2 + $0x1ec] ss:$16 sps:$4 sm:$0xff]  }
  0x36   :  { %1300 = vmatpush1.bf16.msra.mxu0 %v2706_v26  ;;  %v2740_v58 = vld [vmem:[#allocation2 + $0x364] ss:$16 sps:$4 sm:$0xff]   ;;  %v2743_v0 = vld [vmem:[#allocation2 + $0x360] ss:$16 sps:$4 sm:$0xff]  }
  0x37   :  { %1341 = vmatpush1.bf16.msra.mxu1 %v2707_v27  ;;  %1301 = vmatprep.subr.bf16.mxu0 %v2708_v28  ;;  %v289_v59 = vcombine.high %v281_v54, %v281_v54  ;;  %v288_v60 = vrot.slane %v274_v55, %v3182_v49  ;;  %v2744_v1 = vld [vmem:[#allocation2 + $0x144] ss:$16 sps:$4 sm:$0xff]   ;;  %v2748_v4 = vld [vmem:[#allocation2 + $0x140] ss:$16 sps:$4 sm:$0xff]   ;;  %v3197_v13 = vrot.slane %v281_v54, %v3182_v49  ;;  %v2779_v27 = vld [vmem:[#allocation2 + $0xac] ss:$16 sps:$4 sm:$0xff]  }
  0x38   :  { %1342 = vmatprep.subr.bf16.mxu1 %v2710_v29  ;;  %v2746_v2 = vld [vmem:[#allocation2 + $0x344] ss:$16 sps:$4 sm:$0xff]   ;;  %v2749_v5 = vld [vmem:[#allocation2 + $0x340] ss:$16 sps:$4 sm:$0xff]   ;;  %v2777_v29 = vld [vmem:[#allocation2 + $0xa8] ss:$16 sps:$4 sm:$0xff]  }
  0x39   :  { %v311_v62 = vrot.slane %v289_v59, %v3182_v49  ;;  %v3191_v63 = vrot.slane %v288_v60, %v3182_v49  ;;  %v2750_v6 = vld [vmem:[#allocation2 + $0x124] ss:$16 sps:$4 sm:$0xff]   ;;  %v2754_v8 = vld [vmem:[#allocation2 + $0x120] ss:$16 sps:$4 sm:$0xff]   ;;  %v290_v17 = vcombine.high %v288_v60, %v288_v60  ;;  %v3201_v18 = vcombine.high %v3197_v13, %v3197_v13  ;;  %v2813_v54 = vld [vmem:[#allocation2 + $0x1e8] ss:$16 sps:$4 sm:$0xff]  }
  0x3a   :  { %1302 = vmatpush1.bf16.msra.mxu0 %v2712_v30  ;;  %v2752_v7 = vld [vmem:[#allocation2 + $0x324] ss:$16 sps:$4 sm:$0xff]   ;;  %v2755_v9 = vld [vmem:[#allocation2 + $0x320] ss:$16 sps:$4 sm:$0xff]   ;;  %v2827_v60 = vld [vmem:[#allocation2 + $0x1ac] ss:$16 sps:$4 sm:$0xff]  }
  0x3b   :  { %1343 = vmatpush1.bf16.msra.mxu1 %v2713_v31  ;;  %1303 = vmatprep.subr.bf16.mxu0 %v2714_v32  ;;  %v3193_v3 = vcombine.high %v311_v62, %v311_v62  ;;  %v2756_v10 = vld [vmem:[#allocation2 + $0x104] ss:$16 sps:$4 sm:$0xff]   ;;  %v2760_v12 = vld [vmem:[#allocation2 + $0x100] ss:$16 sps:$4 sm:$0xff]   ;;  %v3204_v23 = vrot.slane %v290_v17, %v3182_v49  ;;  %v2785_v31 = vld [vmem:[#allocation2 + $0x8c] ss:$16 sps:$4 sm:$0xff]  }
  0x3c   :  { %1344 = vmatprep.subr.bf16.mxu1 %v2716_v33  ;;  %1319 = vmatprep.mubr.bf16.mxu0 %v311_v62  ;;  %v2758_v11 = vld [vmem:[#allocation2 + $0x304] ss:$16 sps:$4 sm:$0xff]   ;;  %v2761_v14 = vld [vmem:[#allocation2 + $0x300] ss:$16 sps:$4 sm:$0xff]   ;;  %v2783_v33 = vld [vmem:[#allocation2 + $0x88] ss:$16 sps:$4 sm:$0xff]  }
  0x3d   :  { %1360 = vmatprep.mubr.bf16.mxu1 %v3193_v3  ;;  %v2764_v15 = vld [vmem:[#allocation2 + $0x4e4] ss:$16 sps:$4 sm:$0xff]   ;;  %v2762_v19 = vld [vmem:[#allocation2 + $0x4e0] ss:$16 sps:$4 sm:$0xff]   ;;  %v2849_v17 = vld [vmem:[#allocation2 + $0x128] ss:$16 sps:$4 sm:$0xff]  }
  0x3e   :  { %1304 = vmatpush2.bf16.msra.mxu0 %v2718_v34  ;;  %v2770_v21 = vld [vmem:[#allocation2 + $0x4c4] ss:$16 sps:$4 sm:$0xff]   ;;  %v2768_v24 = vld [vmem:[#allocation2 + $0x4c0] ss:$16 sps:$4 sm:$0xff]  }
  0x3f   :  { %1345 = vmatpush2.bf16.msra.mxu1 %v2719_v35  ;;  %1305 = vmatprep.subr.bf16.mxu0 %v2720_v39  ;;  %v2776_v26 = vld [vmem:[#allocation2 + $0x4a4] ss:$16 sps:$4 sm:$0xff]   ;;  %v2774_v28 = vld [vmem:[#allocation2 + $0x4a0] ss:$16 sps:$4 sm:$0xff]   ;;  %v2791_v35 = vld [vmem:[#allocation2 + $0x6c] ss:$16 sps:$4 sm:$0xff]  }
  0x40   :  { %1346 = vmatprep.subr.bf16.mxu1 %v2722_v40  ;;  %v2782_v30 = vld [vmem:[#allocation2 + $0x484] ss:$16 sps:$4 sm:$0xff]   ;;  %v2780_v32 = vld [vmem:[#allocation2 + $0x480] ss:$16 sps:$4 sm:$0xff]   ;;  %v2797_v39 = vld [vmem:[#allocation2 + $0x4c] ss:$16 sps:$4 sm:$0xff]  }
  0x41   :  { %v2788_v34 = vld [vmem:[#allocation2 + $0x464] ss:$16 sps:$4 sm:$0xff]   ;;  %v2786_v36 = vld [vmem:[#allocation2 + $0x460] ss:$16 sps:$4 sm:$0xff]  }
  0x42   :  { %1306 = vmatpush2.bf16.msra.mxu0 %v2724_v41  ;;  %v2794_v38 = vld [vmem:[#allocation2 + $0x444] ss:$16 sps:$4 sm:$0xff]   ;;  %v2792_v40 = vld [vmem:[#allocation2 + $0x440] ss:$16 sps:$4 sm:$0xff]   ;;  %v2795_v41 = vld [vmem:[#allocation2 + $0x48] ss:$16 sps:$4 sm:$0xff]  }
  0x43   :  { %1347 = vmatpush2.bf16.msra.mxu1 %v2725_v44  ;;  %1307 = vmatprep.subr.bf16.mxu0 %v2726_v45  ;;  %v2800_v43 = vld [vmem:[#allocation2 + $0x424] ss:$16 sps:$4 sm:$0xff]   ;;  %v2803_v44 = vld [vmem:[#allocation2 + $0x2c] ss:$16 sps:$4 sm:$0xff]   ;;  %v2798_v45 = vld [vmem:[#allocation2 + $0x420] ss:$16 sps:$4 sm:$0xff]  }
  0x44   :  { %1348 = vmatprep.subr.bf16.mxu1 %v2728_v46  ;;  %v2801_v46 = vld [vmem:[#allocation2 + $0x28] ss:$16 sps:$4 sm:$0xff]   ;;  %v2804_v49 = vld [vmem:[#allocation2 + $0x400] ss:$16 sps:$4 sm:$0xff]   ;;  %v2818_v55 = vld [vmem:[#allocation2 + $0x5c4] ss:$16 sps:$4 sm:$0xff]  }
  0x45   :  { %v2824_v59 = vld [vmem:[#allocation2 + $0x5a4] ss:$16 sps:$4 sm:$0xff]  }
  0x46   :  { %1308 = vmatpush2.bf16.msra.mxu0 %v2730_v47  ;;  %v2806_v47 = vld [vmem:[#allocation2 + $0x404] ss:$16 sps:$4 sm:$0xff]  }
  0x47   :  { %1349 = vmatpush2.bf16.msra.mxu1 %v2731_v48  ;;  %1309 = vmatprep.subr.bf16.mxu0 %v2732_v50  ;;  %v2809_v48 = vld [vmem:[#allocation2 + $0xc] ss:$16 sps:$4 sm:$0xff]   ;;  %v2807_v50 = vld [vmem:[#allocation2 + $0x8] ss:$16 sps:$4 sm:$0xff]  }
  0x48   :  { %1350 = vmatprep.subr.bf16.mxu1 %v2734_v51  ;;  %v2812_v51 = vld [vmem:[#allocation2 + $0x5e4] ss:$16 sps:$4 sm:$0xff]  }
  0x4a   :  { %1310 = vmatpush2.bf16.msra.mxu0 %v2736_v53  ;;  %v2810_v53 = vld [vmem:[#allocation2 + $0x5e0] ss:$16 sps:$4 sm:$0xff]  }
  0x4b   :  { %1351 = vmatpush2.bf16.msra.mxu1 %v2737_v56  ;;  %1311 = vmatprep.subr.bf16.mxu0 %v2738_v57  ;;  %v2821_v56 = vld [vmem:[#allocation2 + $0x1cc] ss:$16 sps:$4 sm:$0xff]   ;;  %v2816_v57 = vld [vmem:[#allocation2 + $0x5c0] ss:$16 sps:$4 sm:$0xff]  }
  0x4c   :  { %1352 = vmatprep.subr.bf16.mxu1 %v2740_v58  ;;  %v2819_v58 = vld [vmem:[#allocation2 + $0x1c8] ss:$16 sps:$4 sm:$0xff]  }
  0x4e   :  { %1312 = vmatpush2.bf16.msra.mxu0 %v2742_v61  ;;  %v2822_v61 = vld [vmem:[#allocation2 + $0x5a0] ss:$16 sps:$4 sm:$0xff]  }
  0x4f   :  { %1353 = vmatpush2.bf16.msra.mxu1 %v2743_v0  ;;  %1313 = vmatprep.subr.bf16.mxu0 %v2744_v1  ;;  %v2830_v0 = vld [vmem:[#allocation2 + $0x584] ss:$16 sps:$4 sm:$0xff]   ;;  %v2833_v1 = vld [vmem:[#allocation2 + $0x18c] ss:$16 sps:$4 sm:$0xff]  }
  0x50   :  { %1354 = vmatprep.subr.bf16.mxu1 %v2746_v2  ;;  %v2828_v2 = vld [vmem:[#allocation2 + $0x580] ss:$16 sps:$4 sm:$0xff]  }
  0x52   :  { %1314 = vmatpush2.bf16.msra.mxu0 %v2748_v4  ;;  %v2831_v4 = vld [vmem:[#allocation2 + $0x188] ss:$16 sps:$4 sm:$0xff]  }
  0x53   :  { %1355 = vmatpush2.bf16.msra.mxu1 %v2749_v5  ;;  %1315 = vmatprep.subr.bf16.mxu0 %v2750_v6  ;;  %v2836_v5 = vld [vmem:[#allocation2 + $0x564] ss:$16 sps:$4 sm:$0xff]   ;;  %v2839_v6 = vld [vmem:[#allocation2 + $0x16c] ss:$16 sps:$4 sm:$0xff]  }
  0x54   :  { %1356 = vmatprep.subr.bf16.mxu1 %v2752_v7  ;;  %v2834_v7 = vld [vmem:[#allocation2 + $0x560] ss:$16 sps:$4 sm:$0xff]  }
  0x56   :  { %1316 = vmatpush2.bf16.msra.mxu0 %v2754_v8  ;;  %v2837_v8 = vld [vmem:[#allocation2 + $0x168] ss:$16 sps:$4 sm:$0xff]  }
  0x57   :  { %1357 = vmatpush2.bf16.msra.mxu1 %v2755_v9  ;;  %1317 = vmatprep.subr.bf16.mxu0 %v2756_v10  ;;  %v2842_v9 = vld [vmem:[#allocation2 + $0x544] ss:$16 sps:$4 sm:$0xff]   ;;  %v2845_v10 = vld [vmem:[#allocation2 + $0x14c] ss:$16 sps:$4 sm:$0xff]  }
  0x58   :  { %1358 = vmatprep.subr.bf16.mxu1 %v2758_v11  ;;  %v2840_v11 = vld [vmem:[#allocation2 + $0x540] ss:$16 sps:$4 sm:$0xff]  }
  0x5a   :  { %1318 = vmatpush2.bf16.msra.mxu0 %v2760_v12  ;;  %v2843_v12 = vld [vmem:[#allocation2 + $0x148] ss:$16 sps:$4 sm:$0xff]  }
  0x5b   :  { %1359 = vmatpush2.bf16.msra.mxu1 %v2761_v14  ;;  %1369 = vmatprep.subr.bf16.mxu0 %v2764_v15  ;;  %v2848_v14 = vld [vmem:[#allocation2 + $0x524] ss:$16 sps:$4 sm:$0xff]   ;;  %v2851_v15 = vld [vmem:[#allocation2 + $0x12c] ss:$16 sps:$4 sm:$0xff]  }
  0x5c   :  { %1410 = vmatprep.subr.bf16.mxu1 %v2767_v16  ;;  %v2846_v16 = vld [vmem:[#allocation2 + $0x520] ss:$16 sps:$4 sm:$0xff]  }
  0x5d   :  { %1320 = vmatmul.mubr.bf16.vlgmr.msra.gmra.mxu0 %v3197_v13 }
  0x5e   :  { %1361 = vmatmul.mubr.bf16.vlgmr.msra.gmra.mxu1 %v3201_v18  ;;  %1370 = vmatpush1.bf16.msra.mxu0 %v2762_v19  ;;  %v2854_v19 = vld [vmem:[#allocation2 + $0x504] ss:$16 sps:$4 sm:$0xff]  }
  0x5f   :  { %1411 = vmatpush1.bf16.msra.mxu1 %v2765_v20  ;;  %1371 = vmatprep.subr.bf16.mxu0 %v2770_v21  ;;  %v2857_v20 = vld [vmem:[#allocation2 + $0x10c] ss:$16 sps:$4 sm:$0xff]   ;;  %v2852_v21 = vld [vmem:[#allocation2 + $0x500] ss:$16 sps:$4 sm:$0xff]  }
  0x60   :  { %1412 = vmatprep.subr.bf16.mxu1 %v2773_v22  ;;  %1401 = vmatprep.mubr.bf16.mxu0 %v3204_v23  ;;  %v2855_v22 = vld [vmem:[#allocation2 + $0x108] ss:$16 sps:$4 sm:$0xff]  }
  0x61   :  { %1442 = vmatprep.mubr.bf16.mxu1 %v311_v62  ;;  %v2825_v62 = vld [vmem:[#allocation2 + $0x1a8] ss:$16 sps:$4 sm:$0xff]  }
  0x62   :  { %1372 = vmatpush1.bf16.msra.mxu0 %v2768_v24  ;;  %v2861_v24 = vld [vmem:[#allocation2 + $0x2ec] ss:$16 sps:$4 sm:$0xff]  }
  0x63   :  { %1413 = vmatpush1.bf16.msra.mxu1 %v2771_v25  ;;  %1373 = vmatprep.subr.bf16.mxu0 %v2776_v26  ;;  %v2864_v25 = vld [vmem:[#allocation2 + $0x4ec] ss:$16 sps:$4 sm:$0xff]   ;;  %v2859_v26 = vld [vmem:[#allocation2 + $0x2e8] ss:$16 sps:$4 sm:$0xff]  }
  0x64   :  { %1414 = vmatprep.subr.bf16.mxu1 %v2779_v27  ;;  %v2862_v27 = vld [vmem:[#allocation2 + $0x4e8] ss:$16 sps:$4 sm:$0xff]  }
  0x66   :  { %1374 = vmatpush1.bf16.msra.mxu0 %v2774_v28  ;;  %v2867_v28 = vld [vmem:[#allocation2 + $0x2cc] ss:$16 sps:$4 sm:$0xff]  }
  0x67   :  { %1415 = vmatpush1.bf16.msra.mxu1 %v2777_v29  ;;  %1375 = vmatprep.subr.bf16.mxu0 %v2782_v30  ;;  %v2870_v29 = vld [vmem:[#allocation2 + $0x4cc] ss:$16 sps:$4 sm:$0xff]   ;;  %v2865_v30 = vld [vmem:[#allocation2 + $0x2c8] ss:$16 sps:$4 sm:$0xff]  }
  0x68   :  { %1416 = vmatprep.subr.bf16.mxu1 %v2785_v31  ;;  %v2868_v31 = vld [vmem:[#allocation2 + $0x4c8] ss:$16 sps:$4 sm:$0xff]  }
  0x6a   :  { %1376 = vmatpush1.bf16.msra.mxu0 %v2780_v32  ;;  %v2873_v32 = vld [vmem:[#allocation2 + $0x2ac] ss:$16 sps:$4 sm:$0xff]  }
  0x6b   :  { %1417 = vmatpush1.bf16.msra.mxu1 %v2783_v33  ;;  %1377 = vmatprep.subr.bf16.mxu0 %v2788_v34  ;;  %v2876_v33 = vld [vmem:[#allocation2 + $0x4ac] ss:$16 sps:$4 sm:$0xff]   ;;  %v2871_v34 = vld [vmem:[#allocation2 + $0x2a8] ss:$16 sps:$4 sm:$0xff]  }
  0x6c   :  { %1418 = vmatprep.subr.bf16.mxu1 %v2791_v35  ;;  %v2874_v35 = vld [vmem:[#allocation2 + $0x4a8] ss:$16 sps:$4 sm:$0xff]  }
  0x6e   :  { %1378 = vmatpush1.bf16.msra.mxu0 %v2786_v36  ;;  %v2879_v36 = vld [vmem:[#allocation2 + $0x28c] ss:$16 sps:$4 sm:$0xff]  }
  0x6f   :  { %1419 = vmatpush1.bf16.msra.mxu1 %v2789_v37  ;;  %1379 = vmatprep.subr.bf16.mxu0 %v2794_v38  ;;  %v2882_v37 = vld [vmem:[#allocation2 + $0x48c] ss:$16 sps:$4 sm:$0xff]   ;;  %v2880_v38 = vld [vmem:[#allocation2 + $0x488] ss:$16 sps:$4 sm:$0xff]  }
  0x70   :  { %1420 = vmatprep.subr.bf16.mxu1 %v2797_v39  ;;  %v2885_v39 = vld [vmem:[#allocation2 + $0x26c] ss:$16 sps:$4 sm:$0xff]  }
  0x72   :  { %1380 = vmatpush1.bf16.msra.mxu0 %v2792_v40  ;;  %v2888_v40 = vld [vmem:[#allocation2 + $0x46c] ss:$16 sps:$4 sm:$0xff]  }
  0x73   :  { %1421 = vmatpush1.bf16.msra.mxu1 %v2795_v41  ;;  %1381 = vmatprep.subr.bf16.mxu0 %v2800_v43  ;;  %v2883_v41 = vld [vmem:[#allocation2 + $0x268] ss:$16 sps:$4 sm:$0xff]   ;;  %v2894_v43 = vld [vmem:[#allocation2 + $0x44c] ss:$16 sps:$4 sm:$0xff]  }
  0x74   :  { %1422 = vmatprep.subr.bf16.mxu1 %v2803_v44  ;;  %v2889_v44 = vld [vmem:[#allocation2 + $0x248] ss:$16 sps:$4 sm:$0xff]  }
  0x76   :  { %1382 = vmatpush1.bf16.msra.mxu0 %v2798_v45  ;;  %v2892_v45 = vld [vmem:[#allocation2 + $0x448] ss:$16 sps:$4 sm:$0xff]  }
  0x77   :  { %1423 = vmatpush1.bf16.msra.mxu1 %v2801_v46  ;;  %1383 = vmatprep.subr.bf16.mxu0 %v2806_v47  ;;  %v2897_v46 = vld [vmem:[#allocation2 + $0x22c] ss:$16 sps:$4 sm:$0xff]  }
  0x78   :  { %1424 = vmatprep.subr.bf16.mxu1 %v2809_v48  ;;  %v2900_v47 = vld [vmem:[#allocation2 + $0x42c] ss:$16 sps:$4 sm:$0xff]   ;;  %v2895_v48 = vld [vmem:[#allocation2 + $0x228] ss:$16 sps:$4 sm:$0xff]  }
  0x7a   :  { %1384 = vmatpush1.bf16.msra.mxu0 %v2804_v49  ;;  %v2898_v49 = vld [vmem:[#allocation2 + $0x428] ss:$16 sps:$4 sm:$0xff]  }
  0x7b   :  { %1425 = vmatpush1.bf16.msra.mxu1 %v2807_v50  ;;  %1385 = vmatprep.subr.bf16.mxu0 %v2812_v51  ;;  %v2903_v50 = vld [vmem:[#allocation2 + $0x20c] ss:$16 sps:$4 sm:$0xff]  }
  0x7c   :  { %1426 = vmatprep.subr.bf16.mxu1 %v2815_v52  ;;  %v2906_v51 = vld [vmem:[#allocation2 + $0x40c] ss:$16 sps:$4 sm:$0xff]   ;;  %v2901_v52 = vld [vmem:[#allocation2 + $0x208] ss:$16 sps:$4 sm:$0xff]  }
  0x7e   :  { %1386 = vmatpush2.bf16.msra.mxu0 %v2810_v53  ;;  %v2904_v53 = vld [vmem:[#allocation2 + $0x408] ss:$16 sps:$4 sm:$0xff]  }
  0x7f   :  { %1427 = vmatpush2.bf16.msra.mxu1 %v2813_v54  ;;  %1387 = vmatprep.subr.bf16.mxu0 %v2818_v55  ;;  %v2909_v54 = vld [vmem:[#allocation2 + $0x3ec] ss:$16 sps:$4 sm:$0xff]  }
  0x80   :  { %1428 = vmatprep.subr.bf16.mxu1 %v2821_v56  ;;  %v2912_v55 = vld [vmem:[#allocation2 + $0x5ec] ss:$16 sps:$4 sm:$0xff]   ;;  %v2907_v56 = vld [vmem:[#allocation2 + $0x3e8] ss:$16 sps:$4 sm:$0xff]  }
  0x82   :  { %1388 = vmatpush2.bf16.msra.mxu0 %v2816_v57  ;;  %v2910_v57 = vld [vmem:[#allocation2 + $0x5e8] ss:$16 sps:$4 sm:$0xff]  }
  0x83   :  { %1429 = vmatpush2.bf16.msra.mxu1 %v2819_v58  ;;  %1389 = vmatprep.subr.bf16.mxu0 %v2824_v59  ;;  %v2915_v58 = vld [vmem:[#allocation2 + $0x3cc] ss:$16 sps:$4 sm:$0xff]  }
  0x84   :  { %1430 = vmatprep.subr.bf16.mxu1 %v2827_v60  ;;  %v2918_v59 = vld [vmem:[#allocation2 + $0x5cc] ss:$16 sps:$4 sm:$0xff]   ;;  %v2913_v60 = vld [vmem:[#allocation2 + $0x3c8] ss:$16 sps:$4 sm:$0xff]  }
  0x86   :  { %1390 = vmatpush2.bf16.msra.mxu0 %v2822_v61  ;;  %v2916_v61 = vld [vmem:[#allocation2 + $0x5c8] ss:$16 sps:$4 sm:$0xff]  }
  0x87   :  { %1431 = vmatpush2.bf16.msra.mxu1 %v2825_v62  ;;  %1391 = vmatprep.subr.bf16.mxu0 %v2830_v0  ;;  %v2921_v62 = vld [vmem:[#allocation2 + $0x3ac] ss:$16 sps:$4 sm:$0xff]  }
  0x88   :  { %1432 = vmatprep.subr.bf16.mxu1 %v2833_v1  ;;  %v2924_v0 = vld [vmem:[#allocation2 + $0x5ac] ss:$16 sps:$4 sm:$0xff]   ;;  %v2919_v1 = vld [vmem:[#allocation2 + $0x3a8] ss:$16 sps:$4 sm:$0xff]  }
  0x8a   :  { %1392 = vmatpush2.bf16.msra.mxu0 %v2828_v2  ;;  %v2922_v2 = vld [vmem:[#allocation2 + $0x5a8] ss:$16 sps:$4 sm:$0xff]  }
  0x8b   :  { %1433 = vmatpush2.bf16.msra.mxu1 %v2831_v4  ;;  %1393 = vmatprep.subr.bf16.mxu0 %v2836_v5  ;;  %v2927_v4 = vld [vmem:[#allocation2 + $0x38c] ss:$16 sps:$4 sm:$0xff]  }
  0x8c   :  { %1434 = vmatprep.subr.bf16.mxu1 %v2839_v6  ;;  %v2930_v5 = vld [vmem:[#allocation2 + $0x58c] ss:$16 sps:$4 sm:$0xff]   ;;  %v2925_v6 = vld [vmem:[#allocation2 + $0x388] ss:$16 sps:$4 sm:$0xff]  }
  0x8e   :  { %1394 = vmatpush2.bf16.msra.mxu0 %v2834_v7  ;;  %v2928_v7 = vld [vmem:[#allocation2 + $0x588] ss:$16 sps:$4 sm:$0xff]  }
  0x8f   :  { %1435 = vmatpush2.bf16.msra.mxu1 %v2837_v8  ;;  %1395 = vmatprep.subr.bf16.mxu0 %v2842_v9  ;;  %v2933_v8 = vld [vmem:[#allocation2 + $0x36c] ss:$16 sps:$4 sm:$0xff]  }
  0x90   :  { %1436 = vmatprep.subr.bf16.mxu1 %v2845_v10  ;;  %v2936_v9 = vld [vmem:[#allocation2 + $0x56c] ss:$16 sps:$4 sm:$0xff]   ;;  %v2931_v10 = vld [vmem:[#allocation2 + $0x368] ss:$16 sps:$4 sm:$0xff]  }
  0x92   :  { %1396 = vmatpush2.bf16.msra.mxu0 %v2840_v11  ;;  %v2934_v11 = vld [vmem:[#allocation2 + $0x568] ss:$16 sps:$4 sm:$0xff]  }
  0x93   :  { %1437 = vmatpush2.bf16.msra.mxu1 %v2843_v12  ;;  %1397 = vmatprep.subr.bf16.mxu0 %v2848_v14  ;;  %v2939_v12 = vld [vmem:[#allocation2 + $0x34c] ss:$16 sps:$4 sm:$0xff]  }
  0x94   :  { %1438 = vmatprep.subr.bf16.mxu1 %v2851_v15  ;;  %v2942_v14 = vld [vmem:[#allocation2 + $0x54c] ss:$16 sps:$4 sm:$0xff]   ;;  %v2937_v15 = vld [vmem:[#allocation2 + $0x348] ss:$16 sps:$4 sm:$0xff]  }
  0x96   :  { %1398 = vmatpush2.bf16.msra.mxu0 %v2846_v16  ;;  %v2940_v16 = vld [vmem:[#allocation2 + $0x548] ss:$16 sps:$4 sm:$0xff]  }
  0x97   :  { %1439 = vmatpush2.bf16.msra.mxu1 %v2849_v17  ;;  %1399 = vmatprep.subr.bf16.mxu0 %v2854_v19  ;;  %v2945_v17 = vld [vmem:[#allocation2 + $0x32c] ss:$16 sps:$4 sm:$0xff]  }
  0x98   :  { %1440 = vmatprep.subr.bf16.mxu1 %v2857_v20  ;;  %v2948_v19 = vld [vmem:[#allocation2 + $0x52c] ss:$16 sps:$4 sm:$0xff]   ;;  %v2943_v20 = vld [vmem:[#allocation2 + $0x328] ss:$16 sps:$4 sm:$0xff]  }
  0x9a   :  { %1400 = vmatpush2.bf16.msra.mxu0 %v2852_v21  ;;  %v2946_v21 = vld [vmem:[#allocation2 + $0x528] ss:$16 sps:$4 sm:$0xff]  }
  0x9b   :  { %1441 = vmatpush2.bf16.msra.mxu1 %v2855_v22  ;;  %1451 = vmatprep.subr.bf16.mxu0 %v2861_v24  ;;  %v2951_v22 = vld [vmem:[#allocation2 + $0x30c] ss:$16 sps:$4 sm:$0xff]  }
  0x9c   :  { %1492 = vmatprep.subr.bf16.mxu1 %v2864_v25  ;;  %v2954_v24 = vld [vmem:[#allocation2 + $0x50c] ss:$16 sps:$4 sm:$0xff]   ;;  %v2949_v25 = vld [vmem:[#allocation2 + $0x308] ss:$16 sps:$4 sm:$0xff]  }
  0x9d   :  { %1402 = vmatmul.mubr.bf16.vlgmr.msra.gmra.mxu0 %v3191_v63 }
  0x9e   :  { %1443 = vmatmul.mubr.bf16.vlgmr.msra.gmra.mxu1 %v3197_v13  ;;  %1452 = vmatpush1.bf16.msra.mxu0 %v2859_v26  ;;  %v2877_v13 = vld [vmem:[#allocation2 + $0x288] ss:$16 sps:$4 sm:$0xff]  }
  0x9f   :  { %1493 = vmatpush1.bf16.msra.mxu1 %v2862_v27  ;;  %1453 = vmatprep.subr.bf16.mxu0 %v2867_v28  ;;  %v2952_v26 = vld [vmem:[#allocation2 + $0x508] ss:$16 sps:$4 sm:$0xff]   ;;  %v2957_v27 = vld [vmem:[#allocation4 + $0x74] ss:$8 sps:$4 sm:$0xff]  }
  0xa0   :  { %1494 = vmatprep.subr.bf16.mxu1 %v2870_v29  ;;  %1483 = vmatprep.mubr.bf16.mxu0 %v3193_v3  ;;  %v2886_v3 = vld [vmem:[#allocation2 + $0x468] ss:$16 sps:$4 sm:$0xff]   ;;  %v2960_v29 = vld [vmem:[#allocation4 + $0x64] ss:$8 sps:$4 sm:$0xff]  }
  0xa1   :  { %1524 = vmatprep.mubr.bf16.mxu1 %v3204_v23  ;;  %v2891_v23 = vld [vmem:[#allocation2 + $0x24c] ss:$16 sps:$4 sm:$0xff]   ;;  %v2955_v28 = vld [vmem:[#allocation4 + $0x70] ss:$8 sps:$4 sm:$0xff]  }
  0xa2   :  { %1454 = vmatpush1.bf16.msra.mxu0 %v2865_v30  ;;  %v2958_v30 = vld [vmem:[#allocation4 + $0x60] ss:$8 sps:$4 sm:$0xff]  }
  0xa3   :  { %1495 = vmatpush1.bf16.msra.mxu1 %v2868_v31  ;;  %1455 = vmatprep.subr.bf16.mxu0 %v2873_v32  ;;  %v2963_v31 = vld [vmem:[#allocation4 + $0x54] ss:$8 sps:$4 sm:$0xff]   ;;  %v2961_v32 = vld [vmem:[#allocation4 + $0x50] ss:$8 sps:$4 sm:$0xff]  }
  0xa4   :  { %1496 = vmatprep.subr.bf16.mxu1 %v2876_v33  ;;  %v2966_v33 = vld [vmem:[#allocation4 + $0x44] ss:$8 sps:$4 sm:$0xff]  }
  0xa6   :  { %1456 = vmatpush1.bf16.msra.mxu0 %v2871_v34  ;;  %v2964_v34 = vld [vmem:[#allocation4 + $0x40] ss:$8 sps:$4 sm:$0xff]  }
  0xa7   :  { %1497 = vmatpush1.bf16.msra.mxu1 %v2874_v35  ;;  %1457 = vmatprep.subr.bf16.mxu0 %v2879_v36  ;;  %v2969_v35 = vld [vmem:[#allocation4 + $0x34] ss:$8 sps:$4 sm:$0xff]   ;;  %v3003_v36 = vld [vmem:[#allocation4 + $0x170] ss:$8 sps:$4 sm:$0xff]  }
  0xa8   :  { %1498 = vmatprep.subr.bf16.mxu1 %v2882_v37  ;;  %v3005_v37 = vld [vmem:[#allocation4 + $0x174] ss:$8 sps:$4 sm:$0xff]  }
  0xaa   :  { %1458 = vmatpush1.bf16.msra.mxu0 %v2877_v13  ;;  %v3008_v13 = vld [vmem:[#allocation4 + $0x164] ss:$8 sps:$4 sm:$0xff]  }
  0xab   :  { %1499 = vmatpush1.bf16.msra.mxu1 %v2880_v38  ;;  %1459 = vmatprep.subr.bf16.mxu0 %v2885_v39  ;;  %v2967_v38 = vld [vmem:[#allocation4 + $0x30] ss:$8 sps:$4 sm:$0xff]   ;;  %v3011_v39 = vld [vmem:[#allocation4 + $0x154] ss:$8 sps:$4 sm:$0xff]  }
  0xac   :  { %1500 = vmatprep.subr.bf16.mxu1 %v2888_v40  ;;  %v2970_v40 = vld [vmem:[#allocation4 + $0x20] ss:$8 sps:$4 sm:$0xff]  }
  0xae   :  { %1460 = vmatpush1.bf16.msra.mxu0 %v2883_v41  ;;  %v2975_v41 = vld [vmem:[#allocation4 + $0x14] ss:$8 sps:$4 sm:$0xff]  }
  0xaf   :  { %1501 = vmatpush1.bf16.msra.mxu1 %v2886_v3  ;;  %1461 = vmatprep.subr.bf16.mxu0 %v2891_v23  ;;  %v3009_v3 = vld [vmem:[#allocation4 + $0x150] ss:$8 sps:$4 sm:$0xff]   ;;  %v3014_v23 = vld [vmem:[#allocation4 + $0x144] ss:$8 sps:$4 sm:$0xff]  }
  0xb0   :  { %1502 = vmatprep.subr.bf16.mxu1 %v2894_v43  ;;  %v2973_v43 = vld [vmem:[#allocation4 + $0x10] ss:$8 sps:$4 sm:$0xff]  }
  0xb2   :  { %1462 = vmatpush1.bf16.msra.mxu0 %v2889_v44  ;;  %v2978_v44 = vld [vmem:[#allocation4 + $0x4] ss:$8 sps:$4 sm:$0xff]  }
  0xb3   :  { %1503 = vmatpush1.bf16.msra.mxu1 %v2892_v45  ;;  %1463 = vmatprep.subr.bf16.mxu0 %v2897_v46  ;;  %v3012_v45 = vld [vmem:[#allocation4 + $0x140] ss:$8 sps:$4 sm:$0xff]   ;;  %v3017_v46 = vld [vmem:[#allocation4 + $0x134] ss:$8 sps:$4 sm:$0xff]  }
  0xb4   :  { %1504 = vmatprep.subr.bf16.mxu1 %v2900_v47  ;;  %v2976_v47 = vld [vmem:[#allocation4] ss:$8 sps:$4 sm:$0xff]  }
  0xb6   :  { %1464 = vmatpush1.bf16.msra.mxu0 %v2895_v48  ;;  %v2981_v48 = vld [vmem:[#allocation4 + $0xf4] ss:$8 sps:$4 sm:$0xff]  }
  0xb7   :  { %1505 = vmatpush1.bf16.msra.mxu1 %v2898_v49  ;;  %1465 = vmatprep.subr.bf16.mxu0 %v2903_v50  ;;  %v3015_v49 = vld [vmem:[#allocation4 + $0x130] ss:$8 sps:$4 sm:$0xff]   ;;  %v3020_v50 = vld [vmem:[#allocation4 + $0x124] ss:$8 sps:$4 sm:$0xff]  }
  0xb8   :  { %1506 = vmatprep.subr.bf16.mxu1 %v2906_v51  ;;  %v2979_v51 = vld [vmem:[#allocation4 + $0xf0] ss:$8 sps:$4 sm:$0xff]  }
  0xba   :  { %1466 = vmatpush1.bf16.msra.mxu0 %v2901_v52  ;;  %v2984_v52 = vld [vmem:[#allocation4 + $0xe4] ss:$8 sps:$4 sm:$0xff]  }
  0xbb   :  { %1507 = vmatpush1.bf16.msra.mxu1 %v2904_v53  ;;  %1467 = vmatprep.subr.bf16.mxu0 %v2909_v54  ;;  %v3018_v53 = vld [vmem:[#allocation4 + $0x120] ss:$8 sps:$4 sm:$0xff]   ;;  %v3023_v54 = vld [vmem:[#allocation4 + $0x114] ss:$8 sps:$4 sm:$0xff]  }
  0xbc   :  { %1508 = vmatprep.subr.bf16.mxu1 %v2912_v55  ;;  %v2982_v55 = vld [vmem:[#allocation4 + $0xe0] ss:$8 sps:$4 sm:$0xff]  }
  0xbe   :  { %1468 = vmatpush2.bf16.msra.mxu0 %v2907_v56  ;;  %v2987_v56 = vld [vmem:[#allocation4 + $0xd4] ss:$8 sps:$4 sm:$0xff]  }
  0xbf   :  { %1509 = vmatpush2.bf16.msra.mxu1 %v2910_v57  ;;  %1469 = vmatprep.subr.bf16.mxu0 %v2915_v58  ;;  %v3021_v57 = vld [vmem:[#allocation4 + $0x110] ss:$8 sps:$4 sm:$0xff]   ;;  %v3026_v58 = vld [vmem:[#allocation4 + $0x104] ss:$8 sps:$4 sm:$0xff]  }
  0xc0   :  { %1510 = vmatprep.subr.bf16.mxu1 %v2918_v59  ;;  %v2985_v59 = vld [vmem:[#allocation4 + $0xd0] ss:$8 sps:$4 sm:$0xff]  }
  0xc2   :  { %1470 = vmatpush2.bf16.msra.mxu0 %v2913_v60  ;;  %v2990_v60 = vld [vmem:[#allocation4 + $0xc4] ss:$8 sps:$4 sm:$0xff]  }
  0xc3   :  { %1511 = vmatpush2.bf16.msra.mxu1 %v2916_v61  ;;  %1471 = vmatprep.subr.bf16.mxu0 %v2921_v62  ;;  %v3024_v61 = vld [vmem:[#allocation4 + $0x100] ss:$8 sps:$4 sm:$0xff]   ;;  %v3029_v62 = vld [vmem:[#allocation4 + $0x1f4] ss:$8 sps:$4 sm:$0xff]  }
  0xc4   :  { %1512 = vmatprep.subr.bf16.mxu1 %v2924_v0  ;;  %v2988_v0 = vld [vmem:[#allocation4 + $0xc0] ss:$8 sps:$4 sm:$0xff]  }
  0xc6   :  { %1472 = vmatpush2.bf16.msra.mxu0 %v2919_v1  ;;  %v2993_v1 = vld [vmem:[#allocation4 + $0xb4] ss:$8 sps:$4 sm:$0xff]  }
  0xc7   :  { %1513 = vmatpush2.bf16.msra.mxu1 %v2922_v2  ;;  %1473 = vmatprep.subr.bf16.mxu0 %v2927_v4  ;;  %v3027_v2 = vld [vmem:[#allocation4 + $0x1f0] ss:$8 sps:$4 sm:$0xff]   ;;  %v3032_v4 = vld [vmem:[#allocation4 + $0x1e4] ss:$8 sps:$4 sm:$0xff]  }
  0xc8   :  { %1514 = vmatprep.subr.bf16.mxu1 %v2930_v5  ;;  %v2991_v5 = vld [vmem:[#allocation4 + $0xb0] ss:$8 sps:$4 sm:$0xff]  }
  0xca   :  { %1474 = vmatpush2.bf16.msra.mxu0 %v2925_v6  ;;  %v2996_v6 = vld [vmem:[#allocation4 + $0xa4] ss:$8 sps:$4 sm:$0xff]  }
  0xcb   :  { %1515 = vmatpush2.bf16.msra.mxu1 %v2928_v7  ;;  %1475 = vmatprep.subr.bf16.mxu0 %v2933_v8  ;;  %v3030_v7 = vld [vmem:[#allocation4 + $0x1e0] ss:$8 sps:$4 sm:$0xff]   ;;  %v3035_v8 = vld [vmem:[#allocation4 + $0x1d4] ss:$8 sps:$4 sm:$0xff]  }
  0xcc   :  { %1516 = vmatprep.subr.bf16.mxu1 %v2936_v9  ;;  %v2994_v9 = vld [vmem:[#allocation4 + $0xa0] ss:$8 sps:$4 sm:$0xff]  }
  0xce   :  { %1476 = vmatpush2.bf16.msra.mxu0 %v2931_v10  ;;  %v2999_v10 = vld [vmem:[#allocation4 + $0x94] ss:$8 sps:$4 sm:$0xff]  }
  0xcf   :  { %1517 = vmatpush2.bf16.msra.mxu1 %v2934_v11  ;;  %1477 = vmatprep.subr.bf16.mxu0 %v2939_v12  ;;  %v3033_v11 = vld [vmem:[#allocation4 + $0x1d0] ss:$8 sps:$4 sm:$0xff]   ;;  %v3038_v12 = vld [vmem:[#allocation4 + $0x1c4] ss:$8 sps:$4 sm:$0xff]  }
  0xd0   :  { %1518 = vmatprep.subr.bf16.mxu1 %v2942_v14  ;;  %v2997_v14 = vld [vmem:[#allocation4 + $0x90] ss:$8 sps:$4 sm:$0xff]  }
  0xd2   :  { %1478 = vmatpush2.bf16.msra.mxu0 %v2937_v15  ;;  %v3002_v15 = vld [vmem:[#allocation4 + $0x84] ss:$8 sps:$4 sm:$0xff]  }
  0xd3   :  { %1519 = vmatpush2.bf16.msra.mxu1 %v2940_v16  ;;  %1479 = vmatprep.subr.bf16.mxu0 %v2945_v17  ;;  %v3036_v16 = vld [vmem:[#allocation4 + $0x1c0] ss:$8 sps:$4 sm:$0xff]   ;;  %v3041_v17 = vld [vmem:[#allocation4 + $0x1b4] ss:$8 sps:$4 sm:$0xff]  }
  0xd4   :  { %1520 = vmatprep.subr.bf16.mxu1 %v2948_v19  ;;  %v3000_v19 = vld [vmem:[#allocation4 + $0x80] ss:$8 sps:$4 sm:$0xff]  }
  0xd6   :  { %1480 = vmatpush2.bf16.msra.mxu0 %v2943_v20  ;;  %v3039_v20 = vld [vmem:[#allocation4 + $0x1b0] ss:$8 sps:$4 sm:$0xff]  }
  0xd7   :  { %1521 = vmatpush2.bf16.msra.mxu1 %v2946_v21  ;;  %1481 = vmatprep.subr.bf16.mxu0 %v2951_v22  ;;  %v3044_v21 = vld [vmem:[#allocation4 + $0x1a4] ss:$8 sps:$4 sm:$0xff]  }
  0xd8   :  { %1522 = vmatprep.subr.bf16.mxu1 %v2954_v24 }
  0xda   :  { %1482 = vmatpush2.bf16.msra.mxu0 %v2949_v25  ;;  %v3042_v25 = vld [vmem:[#allocation4 + $0x1a0] ss:$8 sps:$4 sm:$0xff]  }
  0xdb   :  { %1523 = vmatpush2.bf16.msra.mxu1 %v2952_v26  ;;  %1945 = vmatprep.subr.bf16.mxu0 %v2957_v27 }
  0xdc   :  { %1986 = vmatprep.subr.bf16.mxu1 %v3005_v37  ;;  %v251_v37 = vld [vmem:[%s3313_s2] sm:$0xf] }
  0xdd   :  { %1484 = vmatmul.mubr.bf16.vlgmr.msra.gmra.mxu0 %v3201_v18  ;;  %v3006_v18 = vld [vmem:[#allocation4 + $0x160] ss:$8 sps:$4 sm:$0xff]  }
  0xde   :  { %1525 = vmatmul.mubr.bf16.vlgmr.msra.gmra.mxu1 %v3191_v63  ;;  %1946 = vmatpush1.bf16.msra.mxu0 %v2955_v28  ;;  %v2972_v63 = vld [vmem:[#allocation4 + $0x24] ss:$8 sps:$4 sm:$0xff]   ;;  %v3047_v28 = vld [vmem:[#allocation4 + $0x194] ss:$8 sps:$4 sm:$0xff]  }
  0xdf   :  { %1947 = vmatprep.subr.bf16.mxu0 %v2960_v29  ;;  %1987 = vmatpush1.bf16.msra.mxu1 %v3003_v36  ;;  %v255_v36 = vsub.s32 0, %v3179_v42 }
  0xe0   :  { %1988 = vmatprep.subr.bf16.mxu1 %v3008_v13  ;;  %v259_v13 = vsub.s32 1, %v3179_v42 }
  0xe2   :  { %1948 = vmatpush1.bf16.msra.mxu0 %v2958_v30 }
  0xe3   :  { %1949 = vmatprep.subr.bf16.mxu0 %v2963_v31  ;;  %1989 = vmatpush1.bf16.msra.mxu1 %v3006_v18  ;;  %v3045_v31 = vld [vmem:[#allocation4 + $0x190] ss:$8 sps:$4 sm:$0xff]  }
  0xe4   :  { %1990 = vmatprep.subr.bf16.mxu1 %v3011_v39 }
  0xe6   :  { %1950 = vmatpush1.bf16.msra.mxu0 %v2961_v32 }
  0xe7   :  { %1951 = vmatprep.subr.bf16.mxu0 %v2966_v33  ;;  %1991 = vmatpush1.bf16.msra.mxu1 %v3009_v3 }
  0xe8   :  { %1992 = vmatprep.subr.bf16.mxu1 %v3014_v23 }
  0xea   :  { %1952 = vmatpush1.bf16.msra.mxu0 %v2964_v34  ;;  %v3050_v34 = vld [vmem:[#allocation4 + $0x184] ss:$8 sps:$4 sm:$0xff]  }
  0xeb   :  { %1953 = vmatprep.subr.bf16.mxu0 %v2969_v35  ;;  %1993 = vmatpush1.bf16.msra.mxu1 %v3012_v45  ;;  %v3048_v35 = vld [vmem:[#allocation4 + $0x180] ss:$8 sps:$4 sm:$0xff]  }
  0xec   :  { %1994 = vmatprep.subr.bf16.mxu1 %v3017_v46 }
  0xee   :  { %1954 = vmatpush1.bf16.msra.mxu0 %v2967_v38  ;;  %v256_v38 = vrot.slane %v251_v37, %v255_v36 }
  0xef   :  { %1955 = vmatprep.subr.bf16.mxu0 %v2972_v63  ;;  %1995 = vmatpush1.bf16.msra.mxu1 %v3015_v49  ;;  %v260_v63 = vrot.slane %v251_v37, %v259_v13 }
  0xf0   :  { %1996 = vmatprep.subr.bf16.mxu1 %v3020_v50 }
  0xf2   :  { %1956 = vmatpush1.bf16.msra.mxu0 %v2970_v40 }
  0xf3   :  { %1957 = vmatprep.subr.bf16.mxu0 %v2975_v41  ;;  %1997 = vmatpush1.bf16.msra.mxu1 %v3018_v53 }
  0xf4   :  { %1998 = vmatprep.subr.bf16.mxu1 %v3023_v54 }
  0xf6   :  { %1958 = vmatpush1.bf16.msra.mxu0 %v2973_v43 }
  0xf7   :  { %1959 = vmatprep.subr.bf16.mxu0 %v2978_v44  ;;  %1999 = vmatpush1.bf16.msra.mxu1 %v3021_v57  ;;  %v263_v57 = vsub.s32 2, %v3179_v42 }
  0xf8   :  { %2000 = vmatprep.subr.bf16.mxu1 %v3026_v58  ;;  %v267_v58 = vsub.s32 3, %v3179_v42  ;;  %v3072_v42 = vld [vmem:[%s3318_s7 + $0x10] sm:$0xff]  }
  0xfa   :  { %1960 = vmatpush1.bf16.msra.mxu0 %v2976_v47 }
  0xfb   :  { %1961 = vmatprep.subr.bf16.mxu0 %v2981_v48  ;;  %2001 = vmatpush1.bf16.msra.mxu1 %v3024_v61 }
  0xfc   :  { %2002 = vmatprep.subr.bf16.mxu1 %v3029_v62 }
  0xfe   :  { %1962 = vmatpush2.bf16.msra.mxu0 %v2979_v51 }
  0xff   :  { %1963 = vmatprep.subr.bf16.mxu0 %v2984_v52  ;;  %2003 = vmatpush2.bf16.msra.mxu1 %v3027_v2 }
 0x100   :  { %2004 = vmatprep.subr.bf16.mxu1 %v3032_v4 }
 0x102   :  { %1964 = vmatpush2.bf16.msra.mxu0 %v2982_v55 }
 0x103   :  { %1965 = vmatprep.subr.bf16.mxu0 %v2987_v56  ;;  %2005 = vmatpush2.bf16.msra.mxu1 %v3030_v7 }
 0x104   :  { %2006 = vmatprep.subr.bf16.mxu1 %v3035_v8 }
 0x106   :  { %1966 = vmatpush2.bf16.msra.mxu0 %v2985_v59  ;;  %v264_v59 = vrot.slane %v251_v37, %v263_v57 }
 0x107   :  { %1967 = vmatprep.subr.bf16.mxu0 %v2990_v60  ;;  %2007 = vmatpush2.bf16.msra.mxu1 %v3033_v11  ;;  %v268_v60 = vrot.slane %v251_v37, %v267_v58  ;;  %v3065_v37 = vld [vmem:[%s3316_s5 + $0x40] sm:$0xff]  }
 0x108   :  { %2008 = vmatprep.subr.bf16.mxu1 %v3038_v12 }
 0x10a   :  { %1968 = vmatpush2.bf16.msra.mxu0 %v2988_v0 }
 0x10b   :  { %1969 = vmatprep.subr.bf16.mxu0 %v2993_v1  ;;  %2009 = vmatpush2.bf16.msra.mxu1 %v3036_v16 }
 0x10c   :  { %2010 = vmatprep.subr.bf16.mxu1 %v3041_v17 }
 0x10e   :  { %1970 = vmatpush2.bf16.msra.mxu0 %v2991_v5 }
 0x10f   :  { %1971 = vmatprep.subr.bf16.mxu0 %v2996_v6  ;;  %2011 = vmatpush2.bf16.msra.mxu1 %v3039_v20 }
 0x110   :  { %2012 = vmatprep.subr.bf16.mxu1 %v3044_v21  ;;  %v3051_v21 = vld [vmem:[%s3316_s5 + $0x78] sm:$0xff]  }
 0x112   :  { %1972 = vmatpush2.bf16.msra.mxu0 %v2994_v9 }
 0x113   :  { %1973 = vmatprep.subr.bf16.mxu0 %v2999_v10  ;;  %2013 = vmatpush2.bf16.msra.mxu1 %v3042_v25  ;;  %v3054_v25 = vld [vmem:[%s3316_s5 + $0x30] sm:$0xff]  }
 0x114   :  { %2014 = vmatprep.subr.bf16.mxu1 %v3047_v28  ;;  %v3057_v28 = vld [vmem:[%s3316_s5 + $0x60] sm:$0xff]  }
 0x116   :  { %1974 = vmatpush2.bf16.msra.mxu0 %v2997_v14 }
 0x117   :  { %1975 = vmatprep.subr.bf16.mxu0 %v3002_v15  ;;  %2015 = vmatpush2.bf16.msra.mxu1 %v3045_v31  ;;  %v3060_v31 = vld [vmem:[%s3316_s5 + $0x18] sm:$0xff]  }
 0x118   :  { %2016 = vmatprep.subr.bf16.mxu1 %v3050_v34  ;;  %v3063_v34 = vld [vmem:[%s3316_s5 + $0x48] sm:$0xff]  }
 0x11a   :  { %1976 = vmatpush2.bf16.msra.mxu0 %v3000_v19 }
 0x11b   :  { %2017 = vmatpush2.bf16.msra.mxu1 %v3048_v35  ;;  %2606 = vmatprep.subr.bf16.mxu0 %v3051_v21  ;;  %v3064_v35 = vld [vmem:[%s3316_s5 + $0x8] sm:$0xff]  }
 0x11d   :  { %v1321_v22 = vpop.f32.mrf.mxu0 }
 0x11e   :  { %v1362_v24 = vpop.f32.mrf.mxu1  ;;  %v1322_v18 = vadd.f32 %v1321_v22, %v256_v38  ;;  %v3052_v22 = vld [vmem:[%s3316_s5 + $0x38] sm:$0xff]   ;;  %v3066_v38 = vld [vmem:[%s3316_s5] sm:$0xff]  }
 0x11f   :  { %v1323_v26 = vpop.f32.mrf.mxu0 }
 0x120   :  { %v1364_v27 = vpop.f32.mrf.mxu1  ;;  %v1324_v39 = vadd.f32 %v1323_v26, %v260_v63  ;;  %v1363_v40 = vadd.f32 %v1362_v24, %v1322_v18  ;;  %v3053_v24 = vld [vmem:[%s3316_s5 + $0x70] sm:$0xff]   ;;  %v3055_v26 = vld [vmem:[%s3316_s5 + $0x68] sm:$0xff]   ;;  %v3067_v63 = vld [vmem:[%s3318_s7 + $0x38] sm:$0xff]   ;;  %v3126_v18 = vmov 0.0  }
 0x121   :  { %v1325_v29 = vpop.f32.mrf.mxu0  ;;  %2637 = vmatprep.subr.bf16.mxu1 %v3126_v18 }
 0x122   :  { %v1366_v30 = vpop.f32.mrf.mxu1  ;;  %v1365_v23 = vadd.f32 %v1364_v27, %v1324_v39  ;;  %v3056_v27 = vld [vmem:[%s3316_s5 + $0x28] sm:$0xff]   ;;  %v3058_v29 = vld [vmem:[%s3316_s5 + $0x20] sm:$0xff]   ;;  %v3068_v39 = vld [vmem:[%s3318_s7 + $0x30] sm:$0xff]  }
 0x123   :  { %v1326_v32 = vpop.f32.mrf.mxu0  ;;  %v3059_v30 = vld [vmem:[%s3316_s5 + $0x58] sm:$0xff]  }
 0x124   :  { %v1367_v33 = vpop.f32.mrf.mxu1  ;;  %v3061_v32 = vld [vmem:[%s3316_s5 + $0x50] sm:$0xff]  }
 0x125   :  { %v3062_v33 = vld [vmem:[%s3316_s5 + $0x10] sm:$0xff]  }
 0x15d   :  { %v1403_v41 = vpop.f32.mrf.mxu0 }
 0x15e   :  { %v1444_v3 = vpop.f32.mrf.mxu1  ;;  %v1404_v43 = vadd.f32 %v1403_v41, %v1363_v40  ;;  %v3069_v40 = vld [vmem:[%s3318_s7 + $0x28] sm:$0xff]   ;;  %v3070_v41 = vld [vmem:[%s3318_s7 + $0x20] sm:$0xff]  }
 0x15f   :  { %v1405_v44 = vpop.f32.mrf.mxu0  ;;  %v1445_v61 = vadd.f32 %v1444_v3, %v264_v59  ;;  %v3071_v3 = vld [vmem:[%s3318_s7 + $0x18] sm:$0xff]  }
 0x160   :  { %v1446_v45 = vpop.f32.mrf.mxu1  ;;  %vm1533_vm0 = vcmp.ge.f32.partialorder %v1404_v43, 0.0  ;;  %v1537_v46 = vmul.f32 0.01, %v1404_v43  ;;  %v1406_v47 = vadd.f32 %v1405_v44, %v1365_v23 }
 0x161   :  { %v1407_v48 = vpop.f32.mrf.mxu0  ;;  %v1447_v1 = vadd.f32 %v1446_v45, %v268_v60 }
 0x162   :  { %v1448_v49 = vpop.f32.mrf.mxu1  ;;  %vm1534_vm1 = vcmp.ge.f32.partialorder %v1406_v47, 0.0  ;;  %v1538_v50 = vmul.f32 0.01, %v1406_v47  ;;  %v1541_v51 = vsel %vm1533_vm0, %v1404_v43, %v1537_v46  ;;  %v1613_v46 = vld [vmem:[%s3315_s4] sm:$0x3] }
 0x163   :  { %v1408_v52 = vpop.f32.mrf.mxu0  ;;  %v1545_v56 = vpack.c.bf16 %v1541_v51, %v1541_v51  ;;  %v1622_v48 = vrot.slane %v1613_v46, %v259_v13  ;;  %v3074_v13 = vld [vmem:[%s3318_s7] sm:$0xff]  }
 0x164   :  { %v1449_v53 = vpop.f32.mrf.mxu1  ;;  %v1542_v54 = vsel %vm1534_vm1, %v1406_v47, %v1538_v50  ;;  %v1618_v47 = vrot.slane %v1613_v46, %v255_v36  ;;  %v3073_v36 = vld [vmem:[%s3318_s7 + $0x8] sm:$0xff]  }
 0x165   :  { %v1546_v55 = vpack.c.bf16 %v1542_v54, %v1542_v54 }
 0x167   :  { %1977 = vmatprep.mubr.bf16.mxu0 %v1546_v55 }
 0x168   :  { %1978 = vmatmul.mubr.bf16.vlgmr.msra.gmra.mxu0 %v1545_v56 }
 0x169   :  { %2607 = vmatpush3.bf16.msra.mxu0 %v3052_v22 }
 0x16a   :  { %2608 = vmatprep.subr.bf16.mxu0 %v3053_v24 }
 0x16d   :  { %2609 = vmatpush3.bf16.msra.mxu0 %v3054_v25 }
 0x16e   :  { %2610 = vmatprep.subr.bf16.mxu0 %v3055_v26 }
 0x171   :  { %2611 = vmatpush3.bf16.msra.mxu0 %v3056_v27 }
 0x172   :  { %2612 = vmatprep.subr.bf16.mxu0 %v3057_v28 }
 0x175   :  { %2613 = vmatpush3.bf16.msra.mxu0 %v3058_v29 }
 0x176   :  { %2614 = vmatprep.subr.bf16.mxu0 %v3059_v30 }
 0x179   :  { %2615 = vmatpush3.bf16.msra.mxu0 %v3060_v31 }
 0x17a   :  { %2616 = vmatprep.subr.bf16.mxu0 %v3061_v32 }
 0x17d   :  { %2617 = vmatpush3.bf16.msra.mxu0 %v3062_v33 }
 0x17e   :  { %2618 = vmatprep.subr.bf16.mxu0 %v3063_v34 }
 0x181   :  { %2619 = vmatpush3.bf16.msra.mxu0 %v3064_v35 }
 0x182   :  { %2620 = vmatprep.subr.bf16.mxu0 %v3065_v37 }
 0x185   :  { %2621 = vmatpush3.bf16.msra.mxu0 %v3066_v38 }
 0x19d   :  { %v1485_v62 = vpop.f32.mrf.mxu0 }
 0x19e   :  { %v1526_v0 = vpop.f32.mrf.mxu1  ;;  %v1486_v2 = vadd.f32 %v1485_v62, %v1445_v61 }
 0x19f   :  { %v1487_v4 = vpop.f32.mrf.mxu0 }
 0x1a0   :  { %v1528_v5 = vpop.f32.mrf.mxu1  ;;  %v1527_v6 = vadd.f32 %v1526_v0, %v1486_v2  ;;  %v1488_v7 = vadd.f32 %v1487_v4, %v1447_v1  ;;  %v2581_v1 = vld [vmem:[%s3317_s6] ss:$0 sm:$0xff] }
 0x1a1   :  { %v1489_v8 = vpop.f32.mrf.mxu0 }
 0x1a2   :  { %v1530_v9 = vpop.f32.mrf.mxu1  ;;  %vm1535_vm2 = vcmp.ge.f32.partialorder %v1527_v6, 0.0  ;;  %v1539_v10 = vmul.f32 0.01, %v1527_v6  ;;  %v1529_v11 = vadd.f32 %v1528_v5, %v1488_v7 }
 0x1a3   :  { %v1490_v12 = vpop.f32.mrf.mxu0 }
 0x1a4   :  { %v1531_v14 = vpop.f32.mrf.mxu1  ;;  %vm1536_vm3 = vcmp.ge.f32.partialorder %v1529_v11, 0.0  ;;  %v1540_v15 = vmul.f32 0.01, %v1529_v11  ;;  %v1543_v16 = vsel %vm1535_vm2, %v1527_v6, %v1539_v10 }
 0x1a5   :  { %v1547_v20 = vpack.c.bf16 %v1543_v16, %v1543_v16 }
 0x1a6   :  { %v1544_v17 = vsel %vm1536_vm3, %v1529_v11, %v1540_v15 }
 0x1a7   :  { %v1548_v19 = vpack.c.bf16 %v1544_v17, %v1544_v17 }
 0x1a9   :  { %2018 = vmatprep.mubr.bf16.mxu1 %v1548_v19 }
 0x1aa   :  { %2019 = vmatmul.mubr.bf16.vlgmr.msra.gmra.mxu1 %v1547_v20 }
 0x1ab   :  { %2638 = vmatpush3.bf16.msra.mxu1 %v3067_v63  ;;  %2653 = vmatprep.mubr.msk.bf16.mxu1 %vm3127_vm6, %v3126_v18 }
 0x1ac   :  { %2639 = vmatprep.subr.bf16.mxu1 %v3126_v18 }
 0x1af   :  { %2640 = vmatpush3.bf16.msra.mxu1 %v3068_v39 }
 0x1b0   :  { %2641 = vmatprep.subr.bf16.mxu1 %v3126_v18 }
 0x1b3   :  { %2642 = vmatpush3.bf16.msra.mxu1 %v3069_v40 }
 0x1b4   :  { %2643 = vmatprep.subr.bf16.mxu1 %v3126_v18 }
 0x1b7   :  { %2644 = vmatpush3.bf16.msra.mxu1 %v3070_v41 }
 0x1b8   :  { %2645 = vmatprep.subr.bf16.mxu1 %v3126_v18 }
 0x1bb   :  { %2646 = vmatpush3.bf16.msra.mxu1 %v3071_v3 }
 0x1bc   :  { %2647 = vmatprep.subr.bf16.mxu1 %v3126_v18 }
 0x1bf   :  { %2648 = vmatpush3.bf16.msra.mxu1 %v3072_v42 }
 0x1c0   :  { %2649 = vmatprep.subr.bf16.mxu1 %v3126_v18 }
 0x1c3   :  { %2650 = vmatpush3.bf16.msra.mxu1 %v3073_v36 }
 0x1c4   :  { %2651 = vmatprep.subr.bf16.mxu1 %v3126_v18 }
 0x1c7   :  { %2652 = vmatpush3.bf16.msra.mxu1 %v3074_v13 }
 0x228   :  { %v1979_v23 = vpop.f32.mrf.mxu0 }
 0x229   :  { %v1980_v49 = vadd.f32 %v1979_v23, %v1618_v47 }
 0x22a   :  { %v1981_v43 = vpop.f32.mrf.mxu0 }
 0x22b   :  { %v1982_v51 = vadd.f32 %v1981_v43, %v1622_v48 }
 0x22c   :  { %v1983_v44 = vpop.f32.mrf.mxu0 }
 0x22e   :  { %v1984_v45 = vpop.f32.mrf.mxu0 }
 0x26a   :  { %v2020_v50 = vpop.f32.mrf.mxu1 }
 0x26b   :  { %v2021_v52 = vadd.f32 %v2020_v50, %v1980_v49 }
 0x26c   :  { %v2022_v53 = vpop.f32.mrf.mxu1 }
 0x26d   :  { %vm2027_vm4 = vcmp.ge.f32.partialorder %v2021_v52, 0.0  ;;  %v2029_v54 = vmul.f32 0.01, %v2021_v52  ;;  %v2023_v55 = vadd.f32 %v2022_v53, %v1982_v51 }
 0x26e   :  { %v2024_v56 = vpop.f32.mrf.mxu1 }
 0x26f   :  { %vm2028_vm5 = vcmp.ge.f32.partialorder %v2023_v55, 0.0  ;;  %v2030_v57 = vmul.f32 0.01, %v2023_v55  ;;  %v2031_v58 = vsel %vm2027_vm4, %v2021_v52, %v2029_v54 }
 0x270   :  { %v2025_v59 = vpop.f32.mrf.mxu1  ;;  %v2033_v62 = vpack.c.bf16 %v2031_v58, %v2031_v58 }
 0x271   :  { %v2032_v60 = vsel %vm2028_vm5, %v2023_v55, %v2030_v57 }
 0x272   :  { %v2034_v61 = vpack.c.bf16 %v2032_v60, %v2032_v60 }
 0x274   :  { %2202 = vmatprep.mubr.bf16.mxu0 %v2034_v61 }
 0x275   :  { %2203 = vmatmul.mubr.bf16.vlgmr.msra.gmra.mxu0 %v2033_v62 }
 0x335   :  { %v2622_v0 = vpop.f32.mrf.mxu0 }
 0x337   :  { %v2623_v2 = vpop.f32.mrf.mxu0 }
 0x338   :  { %v2624_v4 = vadd.f32 %v2623_v2, %v2622_v0 }
 0x339   :  { %v2625_v5 = vpop.f32.mrf.mxu0 }
 0x33a   :  { %v2205_v6 = vadd.f32 %v2624_v4, %v2581_v1 }
 0x33b   :  { %v2626_v7 = vpop.f32.mrf.mxu0 }
 0x33c   :  { %vm2210_vm7 = vcmp.ge.f32.partialorder %v2205_v6, 0.0  ;;  %v2211_v8 = vmul.f32 0.01, %v2205_v6 }
 0x33e   :  { %v2212_v9 = vsel %vm2210_vm7, %v2205_v6, %v2211_v8 }
 0x33f   :  { %v2213_v10 = vpack.c.bf16 %v2212_v9, %v2212_v9 }
 0x341   :  { %2654 = vmatmul.mubr.bf16.vlgmr.msra.gmra.mxu1 %v2213_v10 }
 0x401   :  { %v2312_v11 = vpop.f32.mrf.mxu1 }
 0x402   :  { %2318 = vst [vmem:[%s3319_s8] sm:$0x3] %v2312_v11 }
 0x403   :  { %v2655_v12 = vpop.f32.mrf.mxu1 }
 0x405   :  { %v2315_v14 = vpop.f32.mrf.mxu1 }
 0x407   :  { %v2656_v15 = vpop.f32.mrf.mxu1 }
 0x408   :  { %2323 = vsyncpa [#allocation3], 1 }
 0x409   :  { %2324 = vsyncpa [#allocation5], 1 }

</bundles_post_ra>
